<compile_context>
chip_gen: v7x
topology: tpu7x:2x2x1
jax: 0.10.0
libtpu: 0.0.40
codegen_flags: <defaults>
</compile_context>

<pallas_src>
import functools

import jax
import jax.numpy as jnp
from jax.experimental import pallas as pl
from jax.experimental.pallas import tpu as pltpu


def _se_tail_kernel(xin_ref, w1t_ref, b1_ref, xfeat_ref, w2t_ref, out_ref):
    k = pl.program_id(0)

    @pl.when(k == 0)
    def _():
        out_ref[...] = jnp.zeros_like(out_ref)

    # Gate for this Cmid block (1x1 conv on the 1x1 SE vector == matvec):
    #   (1, Cin) @ (Cin, blk) -> (1, blk); sigmoid goes to the EUP slot.
    s = jnp.dot(xin_ref[...], w1t_ref[...], preferred_element_type=jnp.float32)
    gate = jax.nn.sigmoid(s + b1_ref[...])                      # (1, blk)

    # x_feat block arrives in its native (blk, HW) layout; transpose in-kernel
    # (XLU slot is otherwise idle) so the rest of the math stays lane-dense.
    xfeat_t = jnp.transpose(xfeat_ref[...])                     # (HW, blk)

    # Broadcast-multiply over the HW sublanes.
    gated = gate * xfeat_t                                      # (HW, blk)

    # Second 1x1 conv, partial over Cmid: (HW, blk) @ (blk, Cout) -> (HW, Cout),
    # accumulated directly into the resident output block.
    out_ref[...] += jnp.dot(gated, w2t_ref[...], preferred_element_type=jnp.float32)


@functools.partial(jax.jit, static_argnames=("blk",))
def _se_tail_apply(x_se, x_feat, w1t, b1r, w2t, *, blk):
    n, cmid, h, w = x_feat.shape
    cin = w1t.shape[0]
    cout = w2t.shape[1]
    hw = h * w

    xin = x_se.reshape(1, cin).astype(jnp.float32)              # metadata-only
    xfeat = x_feat.reshape(cmid, hw).astype(jnp.float32)        # metadata-only, native layout

    out_t = pl.pallas_call(
        _se_tail_kernel,
        out_shape=jax.ShapeDtypeStruct((hw, cout), jnp.float32),
        grid=(cmid // blk,),
        in_specs=[
            pl.BlockSpec((1, cin), lambda k: (0, 0)),           # x_se vector (constant)
            pl.BlockSpec((cin, blk), lambda k: (0, k)),         # w1^T slice (cached transpose)
            pl.BlockSpec((1, blk), lambda k: (0, k)),           # b1 slice
            pl.BlockSpec((blk, hw), lambda k: (k, 0)),          # x_feat slice, native layout
            pl.BlockSpec((blk, cout), lambda k: (k, 0)),        # w2^T slice (cached transpose)
        ],
        out_specs=pl.BlockSpec((hw, cout), lambda k: (0, 0)),
        compiler_params=pltpu.CompilerParams(
            dimension_semantics=("arbitrary",),                 # Cmid is a reduction axis
        ),
    )(xin, w1t, b1r, xfeat, w2t)

    # (HW, Cout) -> (1, Cout, H, W): tiny 75 KiB layout op, kept out of the kernel
    # so the in-kernel store stays lane-dense / unmasked.
    return jnp.transpose(out_t).reshape(n, cout, h, w)


def _default_blk(cmid):
    blk = 768
    try:
        kind = jax.devices()[0].device_kind.lower()
        if "v7" in kind:                                        # fewer grid steps on v7x
            blk = 1152
    except Exception:
        pass
    if cmid % blk != 0 or blk % 128 != 0:
        blk = cmid
    return blk


def make_se_tail(w1, b1, w2, *, blk=None):
    """w1: (Cmid, Cin, 1, 1), b1: (Cmid,), w2: (Cout, Cmid, 1, 1).
    Returns f(x_se (1,Cin,1,1), x_feat (1,Cmid,H,W)) -> (1,Cout,H,W).
    Weight layout plumbing (transposes) happens here ONCE, not per call."""
    cmid, cin = w1.shape[0], w1.shape[1]
    cout = w2.shape[0]
    if blk is None:
        blk = _default_blk(cmid)
    assert cmid % blk == 0 and blk % 128 == 0, (cmid, blk)

    # One-off cached transposed weights (channels on the lane axis).
    w1t = jnp.asarray(w1.reshape(cmid, cin).T, dtype=jnp.float32)     # (Cin, Cmid)
    b1r = jnp.asarray(b1.reshape(1, cmid), dtype=jnp.float32)         # (1, Cmid)
    w2t = jnp.asarray(w2.reshape(cout, cmid).T, dtype=jnp.float32)    # (Cmid, Cout)

    def call(x_se, x_feat):
        return _se_tail_apply(x_se, x_feat, w1t, b1r, w2t, blk=blk)

    return call


def _reference(x_se, x_feat, w1, b1, w2):
    cin = x_se.shape[1]
    cmid, cout = w1.shape[0], w2.shape[0]
    n, _, h, w = x_feat.shape
    s = w1.reshape(cmid, cin) @ x_se.reshape(cin, 1) + b1.reshape(cmid, 1)
    gate = jax.nn.sigmoid(s)
    gated = gate * x_feat.reshape(cmid, h * w)
    out = w2.reshape(cout, cmid) @ gated
    return out.reshape(n, cout, h, w)


if __name__ == "__main__":
    key = jax.random.PRNGKey(0)
    k_xse, k_xf, k_w1, k_b1, k_w2 = jax.random.split(key, 5)

    CIN, CMID, COUT, H, W = 96, 2304, 384, 7, 7

    x756 = jax.random.normal(k_xse, (1, CIN, 1, 1), dtype=jnp.float32)
    x753 = jax.random.normal(k_xf, (1, CMID, H, W), dtype=jnp.float32)

    # Deterministic parameter init (PyTorch-style uniform +-1/sqrt(fan_in)).
    bound1 = 1.0 / (CIN ** 0.5)
    w1 = jax.random.uniform(k_w1, (CMID, CIN, 1, 1), jnp.float32, -bound1, bound1)
    b1 = jax.random.uniform(k_b1, (CMID,), jnp.float32, -bound1, bound1)
    bound2 = 1.0 / (CMID ** 0.5)
    w2 = jax.random.uniform(k_w2, (COUT, CMID, 1, 1), jnp.float32, -bound2, bound2)

    se_tail = make_se_tail(w1, b1, w2)          # weight transposes cached here (init time)

    out = se_tail(x756, x753)
    out = jax.block_until_ready(out)

    ref = _reference(x756, x753, w1, b1, w2)
    assert out.shape == (1, COUT, H, W), out.shape
    assert jnp.allclose(out, ref, atol=1e-3, rtol=1e-3), "mismatch vs reference"

    print("KERNEL_OK")
</pallas_src>

<mosaic_0001>
module attributes {stable_mosaic.version = 11 : i64} {
  func.func @_se_tail_kernel(%arg0: i32, %arg1: memref<1x96xf32, #tpu.memory_space<vmem>>, %arg2: memref<96x768xf32, #tpu.memory_space<vmem>>, %arg3: memref<1x768xf32, #tpu.memory_space<vmem>>, %arg4: memref<768x49xf32, #tpu.memory_space<vmem>>, %arg5: memref<768x384xf32, #tpu.memory_space<vmem>>, %arg6: memref<49x384xf32, #tpu.memory_space<vmem>>) attributes {dimension_semantics = [#tpu.dimension_semantics<arbitrary>], iteration_bounds = array<i64: 3>, scalar_prefetch = 0 : i64, scratch_operands = 0 : i64, tpu.core_type = #tpu.core_type<tc>, window_params = [{pipeline_mode = #tpu.pipeline_mode<synchronous>, transform_indices = @transform_0, window_bounds = array<i64: 1, 96>}, {transform_indices = @transform_1, window_bounds = array<i64: 96, 768>}, {transform_indices = @transform_2, window_bounds = array<i64: 1, 768>}, {transform_indices = @transform_3, window_bounds = array<i64: 768, 49>}, {transform_indices = @transform_4, window_bounds = array<i64: 768, 384>}, {pipeline_mode = #tpu.pipeline_mode<synchronous>, transform_indices = @transform_5, window_bounds = array<i64: 49, 384>}]} {
    %c0_i32 = arith.constant 0 : i32
    %0 = arith.cmpi eq, %arg0, %c0_i32 : i32
    %1 = arith.extui %0 : i1 to i32
    %c0_i32_0 = arith.constant 0 : i32
    %2 = arith.cmpi ne, %1, %c0_i32_0 : i32
    scf.if %2 {
      %cst_16 = arith.constant 0.000000e+00 : f32
      %22 = vector.broadcast %cst_16 : f32 to vector<49x384xf32>
      %c0_17 = arith.constant 0 : index
      %c0_18 = arith.constant 0 : index
      %23 = vector.load %arg6[%c0_17, %c0_18] : memref<49x384xf32, #tpu.memory_space<vmem>>, vector<49x384xf32>
      tpu.vector_store %arg6[%c0_17, %c0_18], %22 {strides = array<i32>} : memref<49x384xf32, #tpu.memory_space<vmem>>, vector<49x384xf32>,
    } else {
    }
    %c0 = arith.constant 0 : index
    %c0_1 = arith.constant 0 : index
    %3 = vector.load %arg1[%c0, %c0_1] : memref<1x96xf32, #tpu.memory_space<vmem>>, vector<1x96xf32>
    %c0_2 = arith.constant 0 : index
    %c0_3 = arith.constant 0 : index
    %4 = vector.load %arg2[%c0_2, %c0_3] : memref<96x768xf32, #tpu.memory_space<vmem>>, vector<96x768xf32>
    %cst = arith.constant dense<0.000000e+00> : vector<1x768xf32>
    %5 = tpu.matmul %3, %4, %cst {dimension_numbers = #tpu.dot_dimension_numbers<[1], [0], [0], [1], [0, 0, 1, 1], [], []>} : vector<1x96xf32>, vector<96x768xf32>, vector<1x768xf32> -> vector<1x768xf32>
    %c0_4 = arith.constant 0 : index
    %c0_5 = arith.constant 0 : index
    %6 = vector.load %arg3[%c0_4, %c0_5] : memref<1x768xf32, #tpu.memory_space<vmem>>, vector<1x768xf32>
    %7 = arith.addf %5, %6 : vector<1x768xf32>
    %8 = arith.negf %7 : vector<1x768xf32>
    %9 = math.exp %8 : vector<1x768xf32>
    %cst_6 = arith.constant 1.000000e+00 : f32
    %10 = vector.broadcast %cst_6 : f32 to vector<1x768xf32>
    %11 = arith.addf %10, %9 : vector<1x768xf32>
    %12 = arith.divf %10, %11 : vector<1x768xf32>
    %c0_7 = arith.constant 0 : index
    %c0_8 = arith.constant 0 : index
    %13 = vector.load %arg4[%c0_7, %c0_8] : memref<768x49xf32, #tpu.memory_space<vmem>>, vector<768x49xf32>
    %14 = tpu.transpose %13, [1, 0] : vector<768x49xf32> -> vector<49x768xf32>
    %15 = vector.broadcast %12 : vector<1x768xf32> to vector<49x768xf32>
    %16 = arith.mulf %15, %14 : vector<49x768xf32>
    %c0_9 = arith.constant 0 : index
    %c0_10 = arith.constant 0 : index
    %17 = vector.load %arg6[%c0_9, %c0_10] : memref<49x384xf32, #tpu.memory_space<vmem>>, vector<49x384xf32>
    %c0_11 = arith.constant 0 : index
    %c0_12 = arith.constant 0 : index
    %18 = vector.load %arg5[%c0_11, %c0_12] : memref<768x384xf32, #tpu.memory_space<vmem>>, vector<768x384xf32>
    %cst_13 = arith.constant dense<0.000000e+00> : vector<49x384xf32>
    %19 = tpu.matmul %16, %18, %cst_13 {dimension_numbers = #tpu.dot_dimension_numbers<[1], [0], [0], [1], [0, 0, 1, 1], [], []>} : vector<49x768xf32>, vector<768x384xf32>, vector<49x384xf32> -> vector<49x384xf32>
    %20 = arith.addf %17, %19 : vector<49x384xf32>
    %c0_14 = arith.constant 0 : index
    %c0_15 = arith.constant 0 : index
    %21 = vector.load %arg6[%c0_14, %c0_15] : memref<49x384xf32, #tpu.memory_space<vmem>>, vector<49x384xf32>
    tpu.vector_store %arg6[%c0_14, %c0_15], %20 {strides = array<i32>} : memref<49x384xf32, #tpu.memory_space<vmem>>, vector<49x384xf32>,
    return
  }
  func.func @transform_0(%arg0: i32) -> (i32, i32) {
    %c0_i32 = arith.constant 0 : i32
    %c0_i32_0 = arith.constant 0 : i32
    %c0_i32_1 = arith.constant 0 : i32
    return %c0_i32, %c0_i32_0 : i32, i32
  }
  func.func @transform_1(%arg0: i32) -> (i32, i32) {
    %c0_i32 = arith.constant 0 : i32
    %c0_i32_0 = arith.constant 0 : i32
    return %c0_i32, %arg0 : i32, i32
  }
  func.func @transform_2(%arg0: i32) -> (i32, i32) {
    %c0_i32 = arith.constant 0 : i32
    %c0_i32_0 = arith.constant 0 : i32
    return %c0_i32, %arg0 : i32, i32
  }
  func.func @transform_3(%arg0: i32) -> (i32, i32) {
    %c0_i32 = arith.constant 0 : i32
    %c0_i32_0 = arith.constant 0 : i32
    return %arg0, %c0_i32 : i32, i32
  }
  func.func @transform_4(%arg0: i32) -> (i32, i32) {
    %c0_i32 = arith.constant 0 : i32
    %c0_i32_0 = arith.constant 0 : i32
    return %arg0, %c0_i32 : i32, i32
  }
  func.func @transform_5(%arg0: i32) -> (i32, i32) {
    %c0_i32 = arith.constant 0 : i32
    %c0_i32_0 = arith.constant 0 : i32
    %c0_i32_1 = arith.constant 0 : i32
    return %c0_i32, %c0_i32_0 : i32, i32
  }
}

</mosaic_0001>

<bundles_post_ra>
// kernel: _se_tail_apply.1
= control target key start
LH: loop header
LB: loop body
LE: loop exit
PB: predicated region body
PF: predicated region fallthrough
CT: control target
= control target key end

     0   :  { %10 = vsyncpa [#allocation3], 0  ;;  %s3866_s0 = inlined_call_operand.vmem [shape: f32[1,96], index: 0, kind: input, shape index: {}]   ;;  %s3867_s1 = inlined_call_operand.hbm [shape: f32[96,2304], index: 1, kind: input, shape index: {}]   ;;  %s3868_s2 = inlined_call_operand.vmem [shape: f32[1,2304], index: 2, kind: input, shape index: {}]   ;;  %s3869_s3 = inlined_call_operand.vmem [shape: f32[2304,49], index: 3, kind: input, shape index: {}]   ;;  %s3870_s4 = inlined_call_operand.vmem [shape: f32[2304,384], index: 4, kind: input, shape index: {}]   ;;  %s3871_s5 = inlined_call_operand.vmem [shape: f32[49,384], index: 5, kind: output, shape index: {}]  }
   0x1   :  { %12 = vsyncpa [#allocation3 + $0x1], 0  ;;  %s2818_s18 = smov 0   ;;  %s2820_s19 = smov 0  }
   0x2   :  { %s2822_s20 = smov 0   ;;  %s2824_s21 = smov 0  }
   0x3 LB: > { %s2837_s22 = sadd.s32 4294967295, %s2780_s21   ;;  %s2840_s23 = sadd.s32 1, %s2780_s21   ;;  %s2780_s21 = sphi %s2824_s21, %s3877_s21   ;;  %s2776_s20 = sphi %s2822_s20, %s3876_s20   ;;  %s2772_s19 = sphi %s2820_s19, %s3875_s19   ;;  %s2768_s18 = sphi %s2818_s18, %s3874_s18  }
   0x4   : > { %s43_s24 = ssub.s32 %s2780_s21, %s2840_s23  ;;  %s46_s25 = sadd.s32 1, %s2776_s20 }
   0x5   : > { %p44_p0 = scmp.eq.s32.totalorder %s43_s24, 0  ;;  %p53_p1 = scmp.ne.s32.totalorder %s2776_s20, %s2772_s19 }
   0x6   : > { %p54_p2 = scmp.eq.s32.totalorder %s2780_s21, 0  ;;  %p59_p3 = scmp.ne.s32.totalorder %s2772_s19, %s2768_s18 }
   0x7   : > { %s2850_s26 = scalar_select %p44_p0, %s2776_s20, %s46_s25  }
   0x8   : > { %p55_p4 = por %p54_p2, %p53_p1  ;;  %p60_p5 = scmp.eq.s32.totalorder %s2837_s22, 0 }
   0x9   : > { %p2654_p6 = scmp.lt.s32.totalorder %s2780_s21, 3  ;;  %s185_s28 = sand.u32 1, %s2776_s20  }
   0xa   : > { %p2854_p7 = por %p60_p5, %p59_p3  ;;  %s2645_s29 = smul.u32 576, %s185_s28 }
   0xb   : > { %s2097_s30 = smul.u32 768, %s2780_s21  ;;  %p2860_p8 = pnand %p2654_p6, %p55_p4 }
   0xc   : > { %s189_s10 = scalar_lea.vmem [#allocation2], %s2645_s29  ;;  %s2871_s12 = scalar_lea.sflag [#allocation3], %s185_s28 }
   0xd   : > { %s2867_s9 = scalar_lea.hbm %s3867_s1, %s2097_s30  ;;  %s196_s11 = sshll.u32 %s189_s10, 4  ;;  %s2869_s11 = int_to_ptr.vmem [resolvable:$true] %s196_s11 }
   0xe   : > { %s2716_s13 = scalar_lea.hbm %s2867_s9, 9216  ;;  %p2718_p10 = pneg %p2860_p8 }
   0xf   : > { %p2717_p9 = scmp.ne.s32.totalorder %s2867_s9, %s2716_s13  ;;  %s2721_s16 = scalar_lea.hbm %s3867_s1, 27648 }
  0x10   : > { %p2722_p13 = scmp.lt.u32.totalorder %s2867_s9, %s3867_s1  ;;  %p2723_p0 = scmp.lt.u32.totalorder %s2721_s16, %s2716_s13 }
  0x11   : > { %p2719_p11 = pnand %p2718_p10, %p2717_p9  ;;  %p2725_p2 = scmp.lt.u32.totalorder %s2716_s13, %s2867_s9 }
  0x12   : > { %p2724_p1 = por %p2723_p0, %p2722_p13 }
  0x13   : > { %p2720_p12 = pneg %p2719_p11 }
  0x14   : > { %p2726_p3 = por %p2725_p2, %p2724_p1 }
  0x16   : > { %p2727_p4 = pnand %p2726_p3, %p2720_p12 }
  0x18   : > { %2730 = shalt.err (!%p2727_p4)
}
  0x19   : > { %s2731_s24 = scalar_lea.vmem %s2869_s11, 9216  ;;  %s2782_s25 = smov [#allocation2]  }
  0x1a   : > { %p2732_p5 = scmp.ne.s32.totalorder %s2869_s11, %s2731_s24  ;;  %s2736_s28 = sshll.u32 %s2782_s25, 4  ;;  %s2737_s28 = int_to_ptr.vmem [resolvable:$false] %s2736_s28 }
  0x1b   : > { %s2738_s29 = scalar_lea.vmem %s2737_s28, 18432  ;;  %p2739_p11 = scmp.lt.s32.totalorder %s2869_s11, %s2737_s28 }
  0x1c   : > { %p2734_p6 = pnand %p2732_p5, %p2718_p10  ;;  %p2740_p13 = scmp.lt.s32.totalorder %s2738_s29, %s2731_s24 }
  0x1e   : > { %p2735_p9 = pneg %p2734_p6  ;;  %p2741_p0 = por %p2740_p13, %p2739_p11 }
  0x20   : > { %p2742_p1 = pnand %p2741_p0, %p2735_p9 }
  0x22   : > { %2745 = shalt.err (!%p2742_p1)
}
  0x23   : > { %s2783_s30 = smov 2304   ;;  %s2784_s7 = smov 768  }
  0x24   : > { %s2785_s8 = smov 48   ;;  %p2082_p10 = scmp.ge.s32.totalorder %s2780_s21, 1 }
  0x25   : > { %2653 = dma.hbm_to_vmem [thread:$0]  (!%p2860_p8), %s2867_s9, 9216, %s2869_s11, %s2871_s12, %s2783_s30, %s2784_s7, %s2785_s8  }
  0x26   : > { %p231_p12 = scmp.lt.s32.totalorder %s2780_s21, 4 }
  0x28   : > { %p232_p2 = pnand %p2082_p10, %p231_p12 }
  0x29   : > { %s237_s10 = sand.u32 (!%p232_p2), 1, %s2772_s19  }
  0x2a   : > { %235 = sbr.rel (%p232_p2) target bundleno = 704 (0x2c0), region = 40  ;;  %s238_s14 = scalar_lea.sflag (!%p232_p2), [#allocation3], %s237_s10 }
  0x2b   : > { %s2646_s13 = smul.u32 (!%p232_p2), 576, %s237_s10 }
  0x2d   : > { %s2902_s15 = scalar_lea.vmem (!%p232_p2), [#allocation2], %s2646_s13 }
  0x31   : > { %2763 = dma.done.wait (%p2854_p7), %s238_s14, 9216  }
  0x32   : > { %2765 = vsyncadd (%p2854_p7), %s238_s14, 4294958080  ;;  %s279_s6 = smul.u32 6, %s2837_s22  ;;  %p2085_p7 = scmp.ne.s32.totalorder %s2837_s22, 0 }
  0x33   : > { %s284_s9 = smul.u32 96, %s2837_s22  ;;  %v2786_v0 = vmov (!%p2085_p7), 0.0  }
  0x34   : > { %p280_p8 = scmp.lt.s32.totalorder %s279_s6, 17  ;;  %300 = sbr.rel (%p2085_p7) target bundleno = 63 (0x3f), region = 48  ;;  %301 = vst [vmem:[%s3871_s5] sm:$0xff] (!%p2085_p7), %v2786_v0  ;;  %302 = vst [vmem:[%s3871_s5 + $0x8] sm:$0xff] (!%p2085_p7), %v2786_v0 }
  0x35   : > { %p285_p3 = scmp.lt.s32.totalorder %s284_s9, 287  ;;  %303 = vst [vmem:[%s3871_s5 + $0x10] sm:$0xff] (!%p2085_p7), %v2786_v0  ;;  %304 = vst [vmem:[%s3871_s5 + $0x18] sm:$0xff] (!%p2085_p7), %v2786_v0 }
  0x36   : > { %s3879_s6 = smov (!%p280_p8, %s279_s6), 17  ;;  %305 = vst [vmem:[%s3871_s5 + $0x20] sm:$0xff] (!%p2085_p7), %v2786_v0  ;;  %306 = vst [vmem:[%s3871_s5 + $0x28] sm:$0xff] (!%p2085_p7), %v2786_v0 }
  0x37   : > { %s3881_s9 = smov (!%p285_p3, %s284_s9), 287  ;;  %s282_s12 = scalar_lea.vmem %s3868_s2, %s3879_s6  ;;  %307 = vst [vmem:[%s3871_s5 + $0x30] sm:$0xff] (!%p2085_p7), %v2786_v0  ;;  %308 = vst [vmem:[%s3871_s5 + $0x38] sm:$0xff] (!%p2085_p7), %v2786_v0 }
  0x38   : > { %s2083_s16 = sshll.u32 %s3881_s9, 3  ;;  %s2647_s17 = smul.u32 24, %s3881_s9  ;;  %309 = vst [vmem:[%s3871_s5 + $0x40] sm:$0xff] (!%p2085_p7), %v2786_v0  ;;  %310 = vst [vmem:[%s3871_s5 + $0x48] sm:$0xff] (!%p2085_p7), %v2786_v0 }
  0x39   : > { %s2919_s27 = scalar_lea.vmem %s3869_s3, %s2083_s16  ;;  %311 = vst [vmem:[%s3871_s5 + $0x50] sm:$0xff] (!%p2085_p7), %v2786_v0  ;;  %312 = vst [vmem:[%s3871_s5 + $0x58] sm:$0xff] (!%p2085_p7), %v2786_v0 }
  0x3a   : > { %s2924_s29 = scalar_lea.vmem %s3870_s4, %s2647_s17  ;;  %313 = vst [vmem:[%s3871_s5 + $0x60] sm:$0xff] (!%p2085_p7), %v2786_v0  ;;  %314 = vst [vmem:[%s3871_s5 + $0x68] sm:$0xff] (!%p2085_p7), %v2786_v0 }
  0x3b   : > { %315 = vst [vmem:[%s3871_s5 + $0x70] sm:$0xff] %v2786_v0  ;;  %316 = vst [vmem:[%s3871_s5 + $0x78] sm:$0xff] %v2786_v0 }
  0x3c   : > { %317 = vst [vmem:[%s3871_s5 + $0x80] sm:$0xff] %v2786_v0  ;;  %318 = vst [vmem:[%s3871_s5 + $0x88] sm:$0xff] %v2786_v0 }
  0x3d   : > { %319 = vst [vmem:[%s3871_s5 + $0x90] sm:$0x1] %v2786_v0  ;;  %320 = vst [vmem:[%s3871_s5 + $0x98] sm:$0x1] %v2786_v0 }
  0x3e   : > { %321 = vst [vmem:[%s3871_s5 + $0xa0] sm:$0x1] %v2786_v0 }
  0x3f PF: > { %v324_v1 = vld [vmem:[%s2902_s15 + $0x8] sm:$0xff]  ;;  %v330_v2 = vld [vmem:[%s2902_s15 + $0x38] sm:$0xff]  ;;  %v323_v3 = vld [vmem:[%s2902_s15] sm:$0xff]  ;;  %v2787_v8 = vmov 0.0   ;;  %vm427_vm0 = vcmask 785408  }
  0x40   : > { %v2257_v4 = vpack.c.bf16 %v330_v2, %v324_v1  ;;  %v329_v5 = vld [vmem:[%s2902_s15 + $0x30] sm:$0xff]  ;;  %v336_v6 = vld [vmem:[%s2902_s15 + $0x68] sm:$0xff]  ;;  %v342_v7 = vld [vmem:[%s2902_s15 + $0x98] sm:$0xff]  ;;  %495 = vmatprep.mubr.f32.mxu0 %v2787_v8 }
  0x41   : > { %v2259_v9 = vpack.c.bf16 %v329_v5, %v323_v3  ;;  %v2261_v10 = vpack.c.bf16 %v342_v7, %v336_v6  ;;  %v335_v11 = vld [vmem:[%s2902_s15 + $0x60] sm:$0xff]  ;;  %v341_v12 = vld [vmem:[%s2902_s15 + $0x90] sm:$0xff]  ;;  %v348_v13 = vld [vmem:[%s2902_s15 + $0xc8] sm:$0xff] }
  0x42   : > { %2258 = vmatprep.subr.bf16.mxu0 %v2257_v4  ;;  %v354_v14 = vld [vmem:[%s2902_s15 + $0xf8] sm:$0xff]  ;;  %v2263_v15 = vpack.c.bf16 %v341_v12, %v335_v11  ;;  %v347_v17 = vld [vmem:[%s2902_s15 + $0xc0] sm:$0xff]  ;;  %v353_v18 = vld [vmem:[%s2902_s15 + $0xf0] sm:$0xff] }
  0x43   : > { %2260 = vmatpush1.bf16.msra.mxu0 %v2259_v9  ;;  %v2265_v16 = vpack.c.bf16 %v354_v14, %v348_v13  ;;  %v360_v19 = vld [vmem:[%s2902_s15 + $0x128] sm:$0xff]  ;;  %v366_v20 = vld [vmem:[%s2902_s15 + $0x158] sm:$0xff]  ;;  %v2267_v21 = vpack.c.bf16 %v353_v18, %v347_v17  ;;  %v359_v23 = vld [vmem:[%s2902_s15 + $0x120] sm:$0xff] }
  0x44   : > { %2262 = vmatprep.subr.bf16.mxu0 %v2261_v10  ;;  %v2269_v22 = vpack.c.bf16 %v366_v20, %v360_v19  ;;  %v365_v24 = vld [vmem:[%s2902_s15 + $0x150] sm:$0xff]  ;;  %v372_v25 = vld [vmem:[%s2902_s15 + $0x188] sm:$0xff]  ;;  %v378_v26 = vld [vmem:[%s2902_s15 + $0x1b8] sm:$0xff] }
  0x45   : > { %v2271_v27 = vpack.c.bf16 %v365_v24, %v359_v23  ;;  %v2273_v28 = vpack.c.bf16 %v378_v26, %v372_v25  ;;  %v371_v29 = vld [vmem:[%s2902_s15 + $0x180] sm:$0xff]  ;;  %v377_v30 = vld [vmem:[%s2902_s15 + $0x1b0] sm:$0xff]  ;;  %v384_v31 = vld [vmem:[%s2902_s15 + $0x1e8] sm:$0xff] }
  0x46   : > { %v390_v32 = vld [vmem:[%s2902_s15 + $0x218] sm:$0xff]  ;;  %v2275_v33 = vpack.c.bf16 %v377_v30, %v371_v29  ;;  %v383_v35 = vld [vmem:[%s2902_s15 + $0x1e0] sm:$0xff]  ;;  %v389_v36 = vld [vmem:[%s2902_s15 + $0x210] sm:$0xff] }
  0x47   : > { %2264 = vmatpush1.bf16.msra.mxu0 %v2263_v15  ;;  %v2277_v34 = vpack.c.bf16 %v390_v32, %v384_v31  ;;  %v326_v37 = vld [vmem:[%s2902_s15 + $0x18] sm:$0xff]  ;;  %v332_v38 = vld [vmem:[%s2902_s15 + $0x48] sm:$0xff]  ;;  %v2279_v39 = vpack.c.bf16 %v389_v36, %v383_v35  ;;  %v696_v40 = vld [vmem:[%s2919_s27 + $0x80] sm:$0xff] }
  0x48   : > { %2266 = vmatprep.subr.bf16.mxu0 %v2265_v16  ;;  %v680_v41 = vld [vmem:[%s2919_s27] sm:$0xff]  ;;  %v2281_v42 = vpack.c.bf16 %v332_v38, %v326_v37  ;;  %v325_v43 = vld [vmem:[%s2902_s15 + $0x10] sm:$0xff]  ;;  %808 = vxpose.xlu0.b32.start [1/16] (narrow) %v696_v40, 56  ;;  %v338_v45 = vld [vmem:[%s2902_s15 + $0x78] sm:$0xff] }
  0x49   : > { %v331_v44 = vld [vmem:[%s2902_s15 + $0x40] sm:$0xff]  ;;  %v344_v46 = vld [vmem:[%s2902_s15 + $0xa8] sm:$0xff]  ;;  %776 = vxpose.xlu1.b32.start [1/16] (narrow) %v680_v41, 56  ;;  %v337_v52 = vld [vmem:[%s2902_s15 + $0x70] sm:$0xff] }
  0x4a   : > { %v697_v47 = vld [vmem:[%s2919_s27 + $0x88] sm:$0xff]  ;;  %v3028_v49 = vld [vmem:[%s3866_s0] sm:$0x1]  ;;  %v2283_v50 = vpack.c.bf16 %v331_v44, %v325_v43  ;;  %v2285_v51 = vpack.c.bf16 %v344_v46, %v338_v45  ;;  %v350_v54 = vld [vmem:[%s2902_s15 + $0xd8] sm:$0xff] }
  0x4b   : > { %2268 = vmatpush1.bf16.msra.mxu0 %v2267_v21  ;;  %v681_v48 = vld [vmem:[%s2919_s27 + $0x8] sm:$0xff]  ;;  %v343_v53 = vld [vmem:[%s2902_s15 + $0xa0] sm:$0xff]  ;;  %v698_v56 = vld [vmem:[%s2919_s27 + $0x90] sm:$0xff] }
  0x4c   : > { %2270 = vmatprep.subr.bf16.mxu0 %v2269_v22  ;;  %809 = vxpose.xlu0.b32.cont [2/16] (narrow) %v697_v47, 56  ;;  %v356_v55 = vld [vmem:[%s2902_s15 + $0x108] sm:$0xff]  ;;  %v682_v57 = vld [vmem:[%s2919_s27 + $0x10] sm:$0xff]  ;;  %v2287_v58 = vpack.c.bf16 %v343_v53, %v337_v52  ;;  %v355_v61 = vld [vmem:[%s2902_s15 + $0x100] sm:$0xff] }
  0x4d   : > { %777 = vxpose.xlu1.b32.cont [2/16] (narrow) %v681_v48, 56  ;;  %v2289_v59 = vpack.c.bf16 %v356_v55, %v350_v54  ;;  %v349_v60 = vld [vmem:[%s2902_s15 + $0xd0] sm:$0xff]  ;;  %v362_v62 = vld [vmem:[%s2902_s15 + $0x138] sm:$0xff]  ;;  %v368_v63 = vld [vmem:[%s2902_s15 + $0x168] sm:$0xff] }
  0x4e   : > { %v699_v0 = vld [vmem:[%s2919_s27 + $0x98] sm:$0xff]  ;;  %v2291_v2 = vpack.c.bf16 %v355_v61, %v349_v60  ;;  %v2293_v3 = vpack.c.bf16 %v368_v63, %v362_v62  ;;  %v361_v4 = vld [vmem:[%s2902_s15 + $0x130] sm:$0xff]  ;;  %v367_v5 = vld [vmem:[%s2902_s15 + $0x160] sm:$0xff] }
  0x4f   : > { %2272 = vmatpush1.bf16.msra.mxu0 %v2271_v27  ;;  %v683_v1 = vld [vmem:[%s2919_s27 + $0x18] sm:$0xff]  ;;  %v380_v7 = vld [vmem:[%s2902_s15 + $0x1c8] sm:$0xff]  ;;  %v700_v9 = vld [vmem:[%s2919_s27 + $0xa0] sm:$0xff]  ;;  %v2295_v11 = vpack.c.bf16 %v367_v5, %v361_v4 }
  0x50   : > { %2274 = vmatprep.subr.bf16.mxu0 %v2273_v28  ;;  %810 = vxpose.xlu0.b32.cont [3/16] (narrow) %v698_v56, 56  ;;  %v374_v6 = vld [vmem:[%s2902_s15 + $0x198] sm:$0xff]  ;;  %v684_v10 = vld [vmem:[%s2919_s27 + $0x20] sm:$0xff]  ;;  %v373_v13 = vld [vmem:[%s2902_s15 + $0x190] sm:$0xff] }
  0x51   : > { %778 = vxpose.xlu1.b32.cont [3/16] (narrow) %v682_v57, 56  ;;  %v2297_v12 = vpack.c.bf16 %v380_v7, %v374_v6  ;;  %v379_v14 = vld [vmem:[%s2902_s15 + $0x1c0] sm:$0xff]  ;;  %v386_v15 = vld [vmem:[%s2902_s15 + $0x1f8] sm:$0xff]  ;;  %v392_v16 = vld [vmem:[%s2902_s15 + $0x228] sm:$0xff] }
  0x52   : > { %v701_v17 = vld [vmem:[%s2919_s27 + $0xa8] sm:$0xff]  ;;  %v2299_v19 = vpack.c.bf16 %v379_v14, %v373_v13  ;;  %v2301_v20 = vpack.c.bf16 %v392_v16, %v386_v15  ;;  %v385_v21 = vld [vmem:[%s2902_s15 + $0x1f0] sm:$0xff]  ;;  %v391_v22 = vld [vmem:[%s2902_s15 + $0x220] sm:$0xff] }
  0x53   : > { %2276 = vmatpush1.bf16.msra.mxu0 %v2275_v33  ;;  %v685_v18 = vld [vmem:[%s2919_s27 + $0x28] sm:$0xff]  ;;  %v334_v24 = vld [vmem:[%s2902_s15 + $0x58] sm:$0xff]  ;;  %v702_v25 = vld [vmem:[%s2919_s27 + $0xb0] sm:$0xff]  ;;  %v2303_v27 = vpack.c.bf16 %v391_v22, %v385_v21 }
  0x54   : > { %2278 = vmatprep.subr.bf16.mxu0 %v2277_v34  ;;  %811 = vxpose.xlu0.b32.cont [4/16] (narrow) %v699_v0, 56  ;;  %v328_v23 = vld [vmem:[%s2902_s15 + $0x28] sm:$0xff]  ;;  %v686_v26 = vld [vmem:[%s2919_s27 + $0x30] sm:$0xff]  ;;  %v327_v28 = vld [vmem:[%s2902_s15 + $0x20] sm:$0xff] }
  0x55   : > { %779 = vxpose.xlu1.b32.cont [4/16] (narrow) %v683_v1, 56  ;;  %v2305_v29 = vpack.c.bf16 %v334_v24, %v328_v23  ;;  %v333_v30 = vld [vmem:[%s2902_s15 + $0x50] sm:$0xff]  ;;  %v340_v31 = vld [vmem:[%s2902_s15 + $0x88] sm:$0xff]  ;;  %v346_v32 = vld [vmem:[%s2902_s15 + $0xb8] sm:$0xff] }
  0x56   : > { %v703_v33 = vld [vmem:[%s2919_s27 + $0xb8] sm:$0xff]  ;;  %v1056_v34 = vld [vmem:[%s2924_s29 + $0x8] sm:$0xff]  ;;  %v1059_v35 = vld [vmem:[%s2924_s29 + $0x20] sm:$0xff]  ;;  %v2309_v47 = vpack.c.bf16 %v346_v32, %v340_v31 }
  0x57   : > { %2280 = vmatpush1.bf16.msra.mxu0 %v2279_v39  ;;  %v339_v36 = vld [vmem:[%s2902_s15 + $0x80] sm:$0xff]  ;;  %v345_v37 = vld [vmem:[%s2902_s15 + $0xb0] sm:$0xff]  ;;  %v687_v38 = vld [vmem:[%s2919_s27 + $0x38] sm:$0xff]  ;;  %v2329_v39 = vpack.c.bf16 %v1059_v35, %v1056_v34 }
  0x58   : > { %2282 = vmatprep.subr.bf16.mxu0 %v2281_v42  ;;  %812 = vxpose.xlu0.b32.cont [5/16] (narrow) %v700_v9, 56  ;;  %v1055_v40 = vld [vmem:[%s2924_s29] sm:$0xff]  ;;  %v1058_v41 = vld [vmem:[%s2924_s29 + $0x18] sm:$0xff]  ;;  %v2307_v42 = vpack.c.bf16 %v333_v30, %v327_v28  ;;  %v352_v43 = vld [vmem:[%s2902_s15 + $0xe8] sm:$0xff] }
  0x59   : > { %780 = vxpose.xlu1.b32.cont [5/16] (narrow) %v684_v10, 56  ;;  %v2331_v44 = vpack.c.bf16 %v1058_v41, %v1055_v40  ;;  %v1062_v45 = vld [vmem:[%s2924_s29 + $0x38] sm:$0xff]  ;;  %v1065_v46 = vld [vmem:[%s2924_s29 + $0x50] sm:$0xff]  ;;  %v704_v52 = vld [vmem:[%s2919_s27 + $0xc0] sm:$0xff]  ;;  %2330 = vmatprep.subr.bf16.mxu1 %v2329_v39 }
  0x5a   : > { %2086 = vmatmul.mubr.msk.f32.vlgmr.msra.gmra.mrb[0].mxu0 %vm427_vm0, %v3028_v49  ;;  %v358_v48 = vld [vmem:[%s2902_s15 + $0x118] sm:$0xff]  ;;  %v2333_v53 = vpack.c.bf16 %v1065_v46, %v1062_v45  ;;  %v1068_v54 = vld [vmem:[%s2924_s29 + $0x68] sm:$0xff]  ;;  %v1071_v55 = vld [vmem:[%s2924_s29 + $0x80] sm:$0xff] }
  0x5b   : > { %2284 = vmatpush1.bf16.msra.mxu0 %v2283_v50  ;;  %566 = vmatprep.mubr.f32.mxu0 %v2787_v8  ;;  %v1061_v50 = vld [vmem:[%s2924_s29 + $0x30] sm:$0xff]  ;;  %v688_v56 = vld [vmem:[%s2919_s27 + $0x40] sm:$0xff]  ;;  %v2337_v60 = vpack.c.bf16 %v1071_v55, %v1068_v54  ;;  %v1070_v62 = vld [vmem:[%s2924_s29 + $0x78] sm:$0xff]  ;;  %v2313_v63 = vpack.c.bf16 %v358_v48, %v352_v43 }
  0x5c   : > { %2286 = vmatprep.subr.bf16.mxu0 %v2285_v51  ;;  %813 = vxpose.xlu0.b32.cont [6/16] (narrow) %v701_v17, 56  ;;  %v1064_v51 = vld [vmem:[%s2924_s29 + $0x48] sm:$0xff]  ;;  %v1067_v61 = vld [vmem:[%s2924_s29 + $0x60] sm:$0xff]  ;;  %v357_v0 = vld [vmem:[%s2902_s15 + $0x110] sm:$0xff] }
  0x5d   : > { %781 = vxpose.xlu1.b32.cont [6/16] (narrow) %v685_v18, 56  ;;  %2332 = vmatpush1.bf16.msra.mxu1 %v2331_v44  ;;  %v2335_v57 = vpack.c.bf16 %v1064_v51, %v1061_v50  ;;  %v1074_v1 = vld [vmem:[%s2924_s29 + $0x98] sm:$0xff]  ;;  %v705_v5 = vld [vmem:[%s2919_s27 + $0xc8] sm:$0xff]  ;;  %v2339_v6 = vpack.c.bf16 %v1070_v62, %v1067_v61  ;;  %v363_v9 = vld [vmem:[%s2902_s15 + $0x140] sm:$0xff] }
  0x5e   : > { %v370_v4 = vld [vmem:[%s2902_s15 + $0x178] sm:$0xff]  ;;  %2334 = vmatprep.subr.bf16.mxu1 %v2333_v53  ;;  %v369_v14 = vld [vmem:[%s2902_s15 + $0x170] sm:$0xff]  ;;  %v1080_v15 = vld [vmem:[%s2924_s29 + $0xc8] sm:$0xff] }
  0x5f   : > { %2288 = vmatpush1.bf16.msra.mxu0 %v2287_v58  ;;  %v2311_v58 = vpack.c.bf16 %v345_v37, %v339_v36  ;;  %v1083_v16 = vld [vmem:[%s2924_s29 + $0xe0] sm:$0xff]  ;;  %v376_v17 = vld [vmem:[%s2902_s15 + $0x1a8] sm:$0xff]  ;;  %v382_v18 = vld [vmem:[%s2902_s15 + $0x1d8] sm:$0xff]  ;;  %v2319_v22 = vpack.c.bf16 %v369_v14, %v363_v9 }
  0x60   : > { %2290 = vmatprep.subr.bf16.mxu0 %v2289_v59  ;;  %814 = vxpose.xlu0.b32.cont [7/16] (narrow) %v702_v25, 56  ;;  %v351_v59 = vld [vmem:[%s2902_s15 + $0xe0] sm:$0xff]  ;;  %v2345_v24 = vpack.c.bf16 %v1083_v16, %v1080_v15  ;;  %v381_v28 = vld [vmem:[%s2902_s15 + $0x1d0] sm:$0xff]  ;;  %v388_v31 = vld [vmem:[%s2902_s15 + $0x208] sm:$0xff] }
  0x61   : > { %782 = vxpose.xlu1.b32.cont [7/16] (narrow) %v686_v26, 56  ;;  %2336 = vmatpush1.bf16.msra.mxu1 %v2335_v57  ;;  %v2315_v7 = vpack.c.bf16 %v357_v0, %v351_v59  ;;  %v375_v23 = vld [vmem:[%s2902_s15 + $0x1a0] sm:$0xff]  ;;  %v1082_v26 = vld [vmem:[%s2924_s29 + $0xd8] sm:$0xff]  ;;  %v1089_v30 = vld [vmem:[%s2924_s29 + $0x110] sm:$0xff] }
  0x62   : > { %2338 = vmatprep.subr.bf16.mxu1 %v2337_v60  ;;  %v1079_v25 = vld [vmem:[%s2924_s29 + $0xc0] sm:$0xff]  ;;  %v394_v32 = vld [vmem:[%s2902_s15 + $0x238] sm:$0xff]  ;;  %v2323_v36 = vpack.c.bf16 %v381_v28, %v375_v23  ;;  %v1085_v39 = vld [vmem:[%s2924_s29 + $0xf0] sm:$0xff] }
  0x63   : > { %2292 = vmatpush1.bf16.msra.mxu0 %v2291_v2  ;;  %v1077_v2 = vld [vmem:[%s2924_s29 + $0xb0] sm:$0xff]  ;;  %v691_v34 = vld [vmem:[%s2919_s27 + $0x58] sm:$0xff]  ;;  %v2347_v35 = vpack.c.bf16 %v1082_v26, %v1079_v25  ;;  %v387_v37 = vld [vmem:[%s2902_s15 + $0x200] sm:$0xff]  ;;  %v2325_v41 = vpack.c.bf16 %v394_v32, %v388_v31 }
  0x64   : > { %2294 = vmatprep.subr.bf16.mxu0 %v2293_v3  ;;  %815 = vxpose.xlu0.b32.cont [8/16] (narrow) %v703_v33, 56  ;;  %v364_v3 = vld [vmem:[%s2902_s15 + $0x148] sm:$0xff]  ;;  %v2341_v10 = vpack.c.bf16 %v1077_v2, %v1074_v1  ;;  %v707_v33 = vld [vmem:[%s2919_s27 + $0xd8] sm:$0xff]  ;;  %v1095_v44 = vld [vmem:[%s2924_s29 + $0x140] sm:$0xff] }
  0x65   : > { %783 = vxpose.xlu1.b32.cont [8/16] (narrow) %v687_v38, 56  ;;  %v2317_v13 = vpack.c.bf16 %v370_v4, %v364_v3  ;;  %2340 = vmatpush1.bf16.msra.mxu1 %v2339_v6  ;;  %v1088_v40 = vld [vmem:[%s2924_s29 + $0x108] sm:$0xff]  ;;  %v708_v45 = vld [vmem:[%s2919_s27 + $0xe0] sm:$0xff]  ;;  %v1098_v53 = vld [vmem:[%s2924_s29 + $0x158] sm:$0xff] }
  0x66   : > { %2342 = vmatprep.subr.bf16.mxu1 %v2341_v10  ;;  %v1092_v43 = vld [vmem:[%s2924_s29 + $0x128] sm:$0xff]  ;;  %v692_v46 = vld [vmem:[%s2919_s27 + $0x60] sm:$0xff]  ;;  %v1101_v54 = vld [vmem:[%s2924_s29 + $0x170] sm:$0xff] }
  0x67   : > { %2296 = vmatpush1.bf16.msra.mxu0 %v2295_v11  ;;  %v1073_v11 = vld [vmem:[%s2924_s29 + $0x90] sm:$0xff]  ;;  %v2353_v50 = vpack.c.bf16 %v1095_v44, %v1092_v43  ;;  %v1091_v51 = vld [vmem:[%s2924_s29 + $0x120] sm:$0xff]  ;;  %v709_v55 = vld [vmem:[%s2919_s27 + $0xe8] sm:$0xff] }
  0x68   : > { %2298 = vmatprep.subr.bf16.mxu0 %v2297_v12  ;;  %816 = vxpose.xlu0.b32.cont [9/16] (narrow) %v704_v52, 56  ;;  %v1076_v12 = vld [vmem:[%s2924_s29 + $0xa8] sm:$0xff]  ;;  %v1094_v52 = vld [vmem:[%s2924_s29 + $0x138] sm:$0xff]  ;;  %v1097_v59 = vld [vmem:[%s2924_s29 + $0x150] sm:$0xff] }
  0x69   : > { %784 = vxpose.xlu1.b32.cont [9/16] (narrow) %v688_v56, 56  ;;  %v2343_v21 = vpack.c.bf16 %v1076_v12, %v1073_v11  ;;  %v693_v56 = vld [vmem:[%s2919_s27 + $0x68] sm:$0xff]  ;;  %v2355_v57 = vpack.c.bf16 %v1094_v52, %v1091_v51  ;;  %v710_v61 = vld [vmem:[%s2919_s27 + $0xf0] sm:$0xff]  ;;  %v711_v0 = vld [vmem:[%s2919_s27 + $0xf8] sm:$0xff] }
  0x6a   : > { %v1100_v60 = vld [vmem:[%s2924_s29 + $0x168] sm:$0xff]  ;;  %v694_v62 = vld [vmem:[%s2919_s27 + $0x70] sm:$0xff]  ;;  %v695_v1 = vld [vmem:[%s2919_s27 + $0x78] sm:$0xff] }
  0x6b   : > { %2300 = vmatpush1.bf16.msra.mxu0 %v2299_v19  ;;  %v706_v19 = vld [vmem:[%s2919_s27 + $0xd0] sm:$0xff]  ;;  %2344 = vmatpush1.bf16.msra.mxu1 %v2343_v21  ;;  %v728_v2 = vld [vmem:[%s2919_s27 + $0x180] sm:$0xff]  ;;  %v729_v3 = vld [vmem:[%s2919_s27 + $0x188] sm:$0xff] }
  0x6c   : > { %2302 = vmatprep.subr.bf16.mxu0 %v2301_v20  ;;  %817 = vxpose.xlu0.b32.cont [10/16] (narrow) %v705_v5, 56  ;;  %v690_v20 = vld [vmem:[%s2919_s27 + $0x50] sm:$0xff]  ;;  %v713_v4 = vld [vmem:[%s2919_s27 + $0x108] sm:$0xff]  ;;  %v731_v6 = vld [vmem:[%s2919_s27 + $0x198] sm:$0xff] }
  0x6d   : > { %2346 = vmatprep.subr.bf16.mxu1 %v2345_v24  ;;  %v730_v5 = vld [vmem:[%s2919_s27 + $0x190] sm:$0xff]  ;;  %v732_v9 = vld [vmem:[%s2919_s27 + $0x1a0] sm:$0xff]  ;;  %v733_v11 = vld [vmem:[%s2919_s27 + $0x1a8] sm:$0xff] }
  0x6e   : > { %v716_v10 = vld [vmem:[%s2919_s27 + $0x120] sm:$0xff]  ;;  %v717_v12 = vld [vmem:[%s2919_s27 + $0x128] sm:$0xff]  ;;  %v718_v14 = vld [vmem:[%s2919_s27 + $0x130] sm:$0xff] }
  0x6f   : > { %2304 = vmatpush1.bf16.msra.mxu0 %v2303_v27  ;;  %v2321_v27 = vpack.c.bf16 %v382_v18, %v376_v17  ;;  %2348 = vmatpush1.bf16.msra.mxu1 %v2347_v35  ;;  %v735_v15 = vld [vmem:[%s2919_s27 + $0x1b8] sm:$0xff]  ;;  %v1104_v16 = vld [vmem:[%s2924_s29 + $0x188] sm:$0xff]  ;;  %v1107_v17 = vld [vmem:[%s2924_s29 + $0x1a0] sm:$0xff] }
  0x70   : > { %2306 = vmatprep.subr.bf16.mxu0 %v2305_v29  ;;  %818 = vxpose.xlu0.b32.cont [11/16] (narrow) %v706_v19, 56  ;;  %v1086_v29 = vld [vmem:[%s2924_s29 + $0xf8] sm:$0xff]  ;;  %v1105_v18 = vld [vmem:[%s2924_s29 + $0x190] sm:$0xff]  ;;  %v2361_v19 = vpack.c.bf16 %v1107_v17, %v1104_v16  ;;  %v1103_v21 = vld [vmem:[%s2924_s29 + $0x180] sm:$0xff] }
  0x71   : > { %v2349_v38 = vpack.c.bf16 %v1089_v30, %v1086_v29  ;;  %v719_v23 = vld [vmem:[%s2919_s27 + $0x138] sm:$0xff]  ;;  %v1057_v26 = vld [vmem:[%s2924_s29 + $0x10] sm:$0xff]  ;;  %v736_v28 = vld [vmem:[%s2919_s27 + $0x1c0] sm:$0xff] }
  0x72   : > { %2087 = vmatmul.mubr.msk.f32.vlgmr.msra.gmra.mrb[2].mxu0 %vm427_vm0, %v3028_v49  ;;  %v1110_v30 = vld [vmem:[%s2924_s29 + $0x1b8] sm:$0xff]  ;;  %v1113_v31 = vld [vmem:[%s2924_s29 + $0x1d0] sm:$0xff]  ;;  %v1111_v32 = vld [vmem:[%s2924_s29 + $0x1c0] sm:$0xff] }
  0x73   : > { %2308 = vmatpush1.bf16.msra.mxu0 %v2307_v42  ;;  %637 = vmatprep.mubr.f32.mxu0 %v2787_v8  ;;  %v689_v8 = vld [vmem:[%s2919_s27 + $0x48] sm:$0xff]  ;;  %v393_v42 = vld [vmem:[%s2902_s15 + $0x230] sm:$0xff]  ;;  %v1118_v51 = vld [vmem:[%s2924_s29 + $0x1f8] sm:$0xff] }
  0x74   : > { %2310 = vmatprep.subr.bf16.mxu0 %v2309_v47  ;;  %785 = vxpose.xlu1.b32.cont [10/16] (narrow) %v689_v8, 56  ;;  %v2351_v47 = vpack.c.bf16 %v1088_v40, %v1085_v39  ;;  %v2327_v48 = vpack.c.bf16 %v393_v42, %v387_v37  ;;  %v714_v8 = vld [vmem:[%s2919_s27 + $0x110] sm:$0xff]  ;;  %v720_v37 = vld [vmem:[%s2919_s27 + $0x140] sm:$0xff]  ;;  %v737_v42 = vld [vmem:[%s2919_s27 + $0x1c8] sm:$0xff] }
  0x75   : > { %819 = vxpose.xlu0.b32.cont [12/16] (narrow) %v707_v33, 56  ;;  %2350 = vmatprep.subr.bf16.mxu1 %v2349_v38  ;;  %v2365_v33 = vpack.c.bf16 %v1113_v31, %v1110_v30  ;;  %v1109_v35 = vld [vmem:[%s2924_s29 + $0x1b0] sm:$0xff]  ;;  %v1063_v40 = vld [vmem:[%s2924_s29 + $0x40] sm:$0xff]  ;;  %v1116_v44 = vld [vmem:[%s2924_s29 + $0x1e8] sm:$0xff] }
  0x76   : > { %2352 = vmatpush1.bf16.msra.mxu1 %v2351_v47  ;;  %v721_v52 = vld [vmem:[%s2919_s27 + $0x148] sm:$0xff]  ;;  %v1087_v31 = vld [vmem:[%s2924_s29 + $0x100] sm:$0xff] }
  0x77   : > { %2312 = vmatpush1.bf16.msra.mxu0 %v2311_v58  ;;  %2354 = vmatprep.subr.bf16.mxu1 %v2353_v50  ;;  %v2357_v58 = vpack.c.bf16 %v1101_v54, %v1098_v53  ;;  %v1115_v50 = vld [vmem:[%s2924_s29 + $0x1e0] sm:$0xff]  ;;  %v1136_v30 = vld [vmem:[%s2924_s29 + $0x288] sm:$0xff] }
  0x78   : > { %2314 = vmatprep.subr.bf16.mxu0 %v2313_v63  ;;  %786 = vxpose.xlu1.b32.cont [11/16] (narrow) %v690_v20, 56  ;;  %v2359_v63 = vpack.c.bf16 %v1100_v60, %v1097_v59  ;;  %v1108_v20 = vld [vmem:[%s2924_s29 + $0x1a8] sm:$0xff]  ;;  %v2371_v54 = vpack.c.bf16 %v1118_v51, %v1115_v50  ;;  %v1122_v59 = vld [vmem:[%s2924_s29 + $0x218] sm:$0xff]  ;;  %v1125_v60 = vld [vmem:[%s2924_s29 + $0x230] sm:$0xff] }
  0x79   : > { %820 = vxpose.xlu0.b32.cont [13/16] (narrow) %v708_v45, 56  ;;  %v2521_v24 = vpack.c.bf16 %v1108_v20, %v1105_v18  ;;  %v1119_v45 = vld [vmem:[%s2924_s29 + $0x200] sm:$0xff]  ;;  %v1081_v18 = vld [vmem:[%s2924_s29 + $0xd0] sm:$0xff] }
  0x7a   : > { %2356 = vmatpush1.bf16.msra.mxu1 %v2355_v57  ;;  %v2369_v47 = vpack.c.bf16 %v1119_v45, %v1116_v44  ;;  %v738_v57 = vld [vmem:[%s2919_s27 + $0x1d0] sm:$0xff] }
  0x7b   : > { %2316 = vmatpush1.bf16.msra.mxu0 %v2315_v7  ;;  %2358 = vmatprep.subr.bf16.mxu1 %v2357_v58  ;;  %v715_v7 = vld [vmem:[%s2919_s27 + $0x118] sm:$0xff]  ;;  %v726_v51 = vld [vmem:[%s2919_s27 + $0x170] sm:$0xff] }
  0x7c   : > { %2318 = vmatprep.subr.bf16.mxu0 %v2317_v13  ;;  %787 = vxpose.xlu1.b32.cont [12/16] (narrow) %v691_v34, 56  ;;  %v734_v13 = vld [vmem:[%s2919_s27 + $0x1b0] sm:$0xff]  ;;  %v1114_v34 = vld [vmem:[%s2924_s29 + $0x1d8] sm:$0xff] }
  0x7d   : > { %821 = vxpose.xlu0.b32.cont [14/16] (narrow) %v709_v55, 56  ;;  %v2525_v38 = vpack.c.bf16 %v1114_v34, %v1111_v32  ;;  %v1069_v55 = vld [vmem:[%s2924_s29 + $0x70] sm:$0xff]  ;;  %v741_v34 = vld [vmem:[%s2919_s27 + $0x1e8] sm:$0xff] }
  0x7e   : > { %2360 = vmatpush1.bf16.msra.mxu1 %v2359_v63  ;;  %v1126_v63 = vld [vmem:[%s2924_s29 + $0x238] sm:$0xff] }
  0x7f   : > { %2320 = vmatpush1.bf16.msra.mxu0 %v2319_v22  ;;  %v1106_v22 = vld [vmem:[%s2924_s29 + $0x198] sm:$0xff]  ;;  %2362 = vmatprep.subr.bf16.mxu1 %v2361_v19  ;;  %v1084_v19 = vld [vmem:[%s2924_s29 + $0xe8] sm:$0xff] }
  0x80   : > { %2322 = vmatprep.subr.bf16.mxu0 %v2321_v27  ;;  %788 = vxpose.xlu1.b32.cont [13/16] (narrow) %v692_v46, 56  ;;  %v2363_v25 = vpack.c.bf16 %v1106_v22, %v1103_v21  ;;  %v1060_v27 = vld [vmem:[%s2924_s29 + $0x28] sm:$0xff]  ;;  %v1117_v46 = vld [vmem:[%s2924_s29 + $0x1f0] sm:$0xff]  ;;  %v2539_v20 = vpack.c.bf16 %v1084_v19, %v1081_v18  ;;  %v1134_v21 = vld [vmem:[%s2924_s29 + $0x278] sm:$0xff] }
  0x81   : > { %822 = vxpose.xlu0.b32.cont [15/16] (narrow) %v710_v61, 56  ;;  %v2523_v29 = vpack.c.bf16 %v1060_v27, %v1057_v26  ;;  %v1123_v61 = vld [vmem:[%s2924_s29 + $0x220] sm:$0xff]  ;;  %v1137_v22 = vld [vmem:[%s2924_s29 + $0x290] sm:$0xff]  ;;  %v1138_v27 = vld [vmem:[%s2924_s29 + $0x298] sm:$0xff] }
  0x82   : > { %2364 = vmatpush1.bf16.msra.mxu1 %v2363_v25  ;;  %v724_v25 = vld [vmem:[%s2919_s27 + $0x160] sm:$0xff]  ;;  %v749_v18 = vld [vmem:[%s2919_s27 + $0x228] sm:$0xff]  ;;  %v766_v19 = vld [vmem:[%s2919_s27 + $0x2b0] sm:$0xff] }
  0x83   : > { %2324 = vmatpush1.bf16.msra.mxu0 %v2323_v36  ;;  %v1112_v36 = vld [vmem:[%s2924_s29 + $0x1c8] sm:$0xff]  ;;  %2366 = vmatprep.subr.bf16.mxu1 %v2365_v33  ;;  %v1135_v26 = vld [vmem:[%s2924_s29 + $0x280] sm:$0xff]  ;;  %v1090_v33 = vld [vmem:[%s2924_s29 + $0x118] sm:$0xff] }
  0x84   : > { %2326 = vmatprep.subr.bf16.mxu0 %v2325_v41  ;;  %789 = vxpose.xlu1.b32.cont [14/16] (narrow) %v693_v56, 56  ;;  %v2367_v39 = vpack.c.bf16 %v1112_v36, %v1109_v35  ;;  %v1066_v41 = vld [vmem:[%s2924_s29 + $0x58] sm:$0xff]  ;;  %v1072_v56 = vld [vmem:[%s2924_s29 + $0x88] sm:$0xff]  ;;  %v2543_v36 = vpack.c.bf16 %v1090_v33, %v1087_v31  ;;  %v772_v31 = vld [vmem:[%s2919_s27 + $0x2e0] sm:$0xff] }
  0x85   : > { %823 = vxpose.xlu0.b32.end [16/16] (narrow) %v711_v0, 56  ;;  %v2527_v43 = vpack.c.bf16 %v1066_v41, %v1063_v40  ;;  %v2531_v58 = vpack.c.bf16 %v1072_v56, %v1069_v55  ;;  %v1121_v0 = vld [vmem:[%s2924_s29 + $0x210] sm:$0xff]  ;;  %v725_v35 = vld [vmem:[%s2919_s27 + $0x168] sm:$0xff]  ;;  %v1147_v55 = vld [vmem:[%s2924_s29 + $0x2e0] sm:$0xff] }
  0x86   : > { %2368 = vmatpush1.bf16.msra.mxu1 %v2367_v39  ;;  %v1141_v39 = vld [vmem:[%s2924_s29 + $0x2b0] sm:$0xff]  ;;  %v1144_v41 = vld [vmem:[%s2924_s29 + $0x2c8] sm:$0xff]  ;;  %v1150_v56 = vld [vmem:[%s2924_s29 + $0x2f8] sm:$0xff] }
  0x87   : > { %2328 = vmatpush1.bf16.msra.mxu0 %v2327_v48  ;;  %v1120_v48 = vld [vmem:[%s2924_s29 + $0x208] sm:$0xff]  ;;  %2370 = vmatprep.subr.bf16.mxu1 %v2369_v47  ;;  %v2545_v44 = vpack.c.bf16 %v1144_v41, %v1141_v39  ;;  %v397_v39 = vlaneseq }
  0x88   : > { %790 = vxpose.xlu1.b32.cont [15/16] (narrow) %v694_v62, 56  ;;  %2522 = vmatprep.subr.bf16.mxu0 %v2521_v24  ;;  %v2529_v53 = vpack.c.bf16 %v1120_v48, %v1117_v46  ;;  %v2373_v62 = vpack.c.bf16 %v1125_v60, %v1122_v59  ;;  %v2381_v24 = vpack.c.bf16 %v1137_v22, %v1134_v21  ;;  %v1093_v46 = vld [vmem:[%s2924_s29 + $0x130] sm:$0xff]  ;;  %v1096_v47 = vld [vmem:[%s2924_s29 + $0x148] sm:$0xff]  ;;  %v1099_v60 = vld [vmem:[%s2924_s29 + $0x160] sm:$0xff] }
  0x89   : > { %872 = vxpose.xlu0.b32.start [1/16] (narrow) %v728_v2, 56  ;;  %v722_v2 = vld [vmem:[%s2919_s27 + $0x150] sm:$0xff]  ;;  %v2547_v50 = vpack.c.bf16 %v1096_v47, %v1093_v46  ;;  %v1148_v59 = vld [vmem:[%s2924_s29 + $0x2e8] sm:$0xff]  ;;  %v767_v21 = vld [vmem:[%s2919_s27 + $0x2b8] sm:$0xff] }
  0x8a   : > { %2088 = vmatmul.mubr.msk.f32.vlgmr.msra.gmra.mrb[4].mxu0 %vm427_vm0, %v3028_v49  ;;  %v712_v49 = vld [vmem:[%s2919_s27 + $0x100] sm:$0xff]  ;;  %2372 = vmatpush1.bf16.msra.mxu1 %v2371_v54  ;;  %v742_v48 = vld [vmem:[%s2919_s27 + $0x1f0] sm:$0xff]  ;;  %v751_v22 = vld [vmem:[%s2919_s27 + $0x238] sm:$0xff] }
  0x8b   : > { %2524 = vmatpush3.bf16.msra.mxu0 %v2523_v29  ;;  %2374 = vmatprep.subr.bf16.mxu1 %v2373_v62  ;;  %v1133_v29 = vld [vmem:[%s2924_s29 + $0x270] sm:$0xff]  ;;  %v773_v33 = vld [vmem:[%s2919_s27 + $0x2e8] sm:$0xff] }
  0x8c   : > { %791 = vxpose.xlu1.b32.end [16/16] (narrow) %v695_v1, 56  ;;  %2526 = vmatprep.subr.bf16.mxu0 %v2525_v38  ;;  %v1124_v1 = vld [vmem:[%s2924_s29 + $0x228] sm:$0xff]  ;;  %v2383_v32 = vpack.c.bf16 %v1136_v30, %v1133_v29  ;;  %v1143_v38 = vld [vmem:[%s2924_s29 + $0x2c0] sm:$0xff]  ;;  %v771_v29 = vld [vmem:[%s2919_s27 + $0x2d8] sm:$0xff] }
  0x8d   : > { %873 = vxpose.xlu0.b32.cont [2/16] (narrow) %v729_v3, 56  ;;  %v2375_v3 = vpack.c.bf16 %v1124_v1, %v1121_v0  ;;  %v727_v0 = vld [vmem:[%s2919_s27 + $0x178] sm:$0xff] }
  0x8e   : > { %v755_v30 = vld [vmem:[%s2919_s27 + $0x258] sm:$0xff] }
  0x8f   : > { %2528 = vmatpush3.bf16.msra.mxu0 %v2527_v43  ;;  %2376 = vmatpush1.bf16.msra.mxu1 %v2375_v3  ;;  %v1142_v43 = vld [vmem:[%s2924_s29 + $0x2b8] sm:$0xff]  ;;  %v1201_v3 = vld [vmem:[%s2924_s29 + $0x490] sm:$0xff] }
  0x90   : > { %840 = vxpose.xlu1.b32.start [1/16] (narrow) %v712_v49, 56  ;;  %2530 = vmatprep.subr.bf16.mxu0 %v2529_v53  ;;  %v2533_v49 = vpack.c.bf16 %v1126_v63, %v1123_v61  ;;  %v1149_v53 = vld [vmem:[%s2924_s29 + $0x2f0] sm:$0xff]  ;;  %v743_v61 = vld [vmem:[%s2919_s27 + $0x1f8] sm:$0xff] }
  0x91   : > { %874 = vxpose.xlu0.b32.cont [3/16] (narrow) %v730_v5, 56  ;;  %v1078_v5 = vld [vmem:[%s2924_s29 + $0xb8] sm:$0xff] }
  0x92   : > { %v1102_v63 = vld [vmem:[%s2924_s29 + $0x178] sm:$0xff] }
  0x93   : > { %2532 = vmatpush3.bf16.msra.mxu0 %v2531_v58  ;;  %v1145_v58 = vld [vmem:[%s2924_s29 + $0x2d0] sm:$0xff]  ;;  %v2551_v1 = vpack.c.bf16 %v1102_v63, %v1099_v60 }
  0x94   : > { %841 = vxpose.xlu1.b32.cont [2/16] (narrow) %v713_v4, 56  ;;  %v1075_v4 = vld [vmem:[%s2924_s29 + $0xa0] sm:$0xff]  ;;  %2534 = vmatprep.subr.bf16.mxu0 %v2533_v49  ;;  %v2391_v62 = vpack.c.bf16 %v1148_v59, %v1145_v58 }
  0x95   : > { %875 = vxpose.xlu0.b32.cont [4/16] (narrow) %v731_v6, 56  ;;  %v2535_v6 = vpack.c.bf16 %v1078_v5, %v1075_v4  ;;  %v1155_v49 = vld [vmem:[%s2924_s29 + $0x320] sm:$0xff]  ;;  %v1204_v5 = vld [vmem:[%s2924_s29 + $0x4a8] sm:$0xff] }
  0x97   : > { %2536 = vmatpush3.bf16.msra.mxu0 %v2535_v6  ;;  %v2553_v6 = vpack.c.bf16 %v1204_v5, %v1201_v3 }
  0x98   : > { %842 = vxpose.xlu1.b32.cont [3/16] (narrow) %v714_v8, 56  ;;  %v739_v8 = vld [vmem:[%s2919_s27 + $0x1d8] sm:$0xff] }
  0x99   : > { %876 = vxpose.xlu0.b32.cont [5/16] (narrow) %v732_v9, 56  ;;  %v1131_v9 = vld [vmem:[%s2924_s29 + $0x260] sm:$0xff] }
  0x9c   : > { %843 = vxpose.xlu1.b32.cont [4/16] (narrow) %v715_v7, 56  ;;  %v1128_v7 = vld [vmem:[%s2924_s29 + $0x248] sm:$0xff] }
  0x9d   : > { %877 = vxpose.xlu0.b32.cont [6/16] (narrow) %v733_v11, 56  ;;  %v2377_v11 = vpack.c.bf16 %v1131_v9, %v1128_v7  ;;  %v744_v7 = vld [vmem:[%s2919_s27 + $0x200] sm:$0xff]  ;;  %v761_v9 = vld [vmem:[%s2919_s27 + $0x288] sm:$0xff] }
  0x9f   : > { %2378 = vmatprep.subr.bf16.mxu1 %v2377_v11  ;;  %v762_v11 = vld [vmem:[%s2919_s27 + $0x290] sm:$0xff] }
  0xa0   : > { %844 = vxpose.xlu1.b32.cont [5/16] (narrow) %v716_v10, 56  ;;  %v1129_v10 = vld [vmem:[%s2924_s29 + $0x250] sm:$0xff] }
  0xa1   : > { %878 = vxpose.xlu0.b32.cont [7/16] (narrow) %v734_v13, 56  ;;  %v1127_v13 = vld [vmem:[%s2924_s29 + $0x240] sm:$0xff] }
  0xa4   : > { %845 = vxpose.xlu1.b32.cont [6/16] (narrow) %v717_v12, 56  ;;  %v1132_v12 = vld [vmem:[%s2924_s29 + $0x268] sm:$0xff] }
  0xa5   : > { %879 = vxpose.xlu0.b32.cont [8/16] (narrow) %v735_v15, 56  ;;  %v723_v15 = vld [vmem:[%s2919_s27 + $0x158] sm:$0xff]  ;;  %v2537_v16 = vpack.c.bf16 %v1132_v12, %v1129_v10  ;;  %v745_v10 = vld [vmem:[%s2919_s27 + $0x208] sm:$0xff]  ;;  %v746_v12 = vld [vmem:[%s2919_s27 + $0x210] sm:$0xff] }
  0xa7   : > { %2538 = vmatprep.subr.bf16.mxu0 %v2537_v16  ;;  %v748_v16 = vld [vmem:[%s2919_s27 + $0x220] sm:$0xff] }
  0xa8   : > { %846 = vxpose.xlu1.b32.cont [7/16] (narrow) %v718_v14, 56  ;;  %v1130_v14 = vld [vmem:[%s2924_s29 + $0x258] sm:$0xff]  ;;  %2540 = vmatpush3.bf16.msra.mxu0 %v2539_v20  ;;  %v750_v20 = vld [vmem:[%s2919_s27 + $0x230] sm:$0xff] }
  0xa9   : > { %880 = vxpose.xlu0.b32.cont [9/16] (narrow) %v736_v28, 56  ;;  %v2379_v17 = vpack.c.bf16 %v1130_v14, %v1127_v13  ;;  %v2541_v28 = vpack.c.bf16 %v1138_v27, %v1135_v26  ;;  %v763_v13 = vld [vmem:[%s2919_s27 + $0x298] sm:$0xff]  ;;  %v753_v26 = vld [vmem:[%s2919_s27 + $0x248] sm:$0xff]  ;;  %v770_v27 = vld [vmem:[%s2919_s27 + $0x2d0] sm:$0xff] }
  0xaa   : > { %v747_v14 = vld [vmem:[%s2919_s27 + $0x218] sm:$0xff] }
  0xab   : > { %2380 = vmatpush1.bf16.msra.mxu1 %v2379_v17  ;;  %2542 = vmatprep.subr.bf16.mxu0 %v2541_v28  ;;  %v765_v17 = vld [vmem:[%s2919_s27 + $0x2a8] sm:$0xff]  ;;  %v754_v28 = vld [vmem:[%s2919_s27 + $0x250] sm:$0xff] }
  0xac   : > { %847 = vxpose.xlu1.b32.cont [8/16] (narrow) %v719_v23, 56  ;;  %v740_v23 = vld [vmem:[%s2919_s27 + $0x1e0] sm:$0xff]  ;;  %2382 = vmatprep.subr.bf16.mxu1 %v2381_v24 }
  0xad   : > { %881 = vxpose.xlu0.b32.cont [10/16] (narrow) %v737_v42, 56  ;;  %2544 = vmatpush3.bf16.msra.mxu0 %v2543_v36  ;;  %v1139_v42 = vld [vmem:[%s2924_s29 + $0x2a0] sm:$0xff]  ;;  %v758_v36 = vld [vmem:[%s2919_s27 + $0x270] sm:$0xff] }
  0xae   : > { %v2387_v45 = vpack.c.bf16 %v1142_v43, %v1139_v42  ;;  %2546 = vmatprep.subr.bf16.mxu0 %v2545_v44  ;;  %v752_v24 = vld [vmem:[%s2919_s27 + $0x240] sm:$0xff] }
  0xaf   : > { %2384 = vmatpush1.bf16.msra.mxu1 %v2383_v32  ;;  %v756_v32 = vld [vmem:[%s2919_s27 + $0x260] sm:$0xff] }
  0xb0   : > { %848 = vxpose.xlu1.b32.cont [9/16] (narrow) %v720_v37, 56  ;;  %v1140_v37 = vld [vmem:[%s2924_s29 + $0x2a8] sm:$0xff]  ;;  %v3282_v42 = vld [vmem:[%s282_s12] sm:$0x3f] }
  0xb1   : > { %882 = vxpose.xlu0.b32.cont [11/16] (narrow) %v738_v57, 56  ;;  %v2385_v40 = vpack.c.bf16 %v1143_v38, %v1140_v37  ;;  %2548 = vmatpush3.bf16.msra.mxu0 %v2547_v50  ;;  %v2549_v57 = vpack.c.bf16 %v1150_v56, %v1147_v55  ;;  %v775_v37 = vld [vmem:[%s2919_s27 + $0x2f8] sm:$0xff] }
  0xb2   : > { %v759_v38 = vld [vmem:[%s2919_s27 + $0x278] sm:$0xff] }
  0xb3   : > { %2386 = vmatprep.subr.bf16.mxu1 %v2385_v40  ;;  %2550 = vmatprep.subr.bf16.mxu0 %v2549_v57  ;;  %v3272_v40 = vshrl.u32 %v397_v39, 7  ;;  %v1167_v39 = vld [vmem:[%s2924_s29 + $0x380] sm:$0xff] }
  0xb4   : > { %849 = vxpose.xlu1.b32.cont [10/16] (narrow) %v721_v52, 56  ;;  %2388 = vmatpush1.bf16.msra.mxu1 %v2387_v45  ;;  %v1146_v52 = vld [vmem:[%s2924_s29 + $0x2d8] sm:$0xff] }
  0xb5   : > { %883 = vxpose.xlu0.b32.cont [12/16] (narrow) %v739_v8, 56  ;;  %v2389_v54 = vpack.c.bf16 %v1149_v53, %v1146_v52  ;;  %2552 = vmatpush3.bf16.msra.mxu0 %v2551_v1  ;;  %v760_v8 = vld [vmem:[%s2919_s27 + $0x280] sm:$0xff]  ;;  %v3275_v41 = vsub.s32 0, %v3272_v40  ;;  %v403_v43 = vsub.s32 1, %v3272_v40 }
  0xb6   : > { %2554 = vmatprep.subr.bf16.mxu0 %v2553_v6 }
  0xb7   : > { %2390 = vmatprep.subr.bf16.mxu1 %v2389_v54  ;;  %v400_v44 = vrot.slane %v3282_v42, %v3275_v41  ;;  %v404_v45 = vrot.slane %v3282_v42, %v403_v43  ;;  %v1213_v43 = vld [vmem:[%s2924_s29 + $0x4f0] sm:$0xff] }
  0xb8   : > { %850 = vxpose.xlu1.b32.cont [11/16] (narrow) %v722_v2, 56  ;;  %2392 = vmatpush1.bf16.msra.mxu1 %v2391_v62  ;;  %v1152_v2 = vld [vmem:[%s2924_s29 + $0x308] sm:$0xff] }
  0xb9   : > { %884 = vxpose.xlu0.b32.cont [13/16] (narrow) %v740_v23, 56  ;;  %v2393_v4 = vpack.c.bf16 %v1155_v49, %v1152_v2  ;;  %v768_v23 = vld [vmem:[%s2919_s27 + $0x2c0] sm:$0xff]  ;;  %v411_v2 = vsub.s32 3, %v3272_v40 }
  0xbb   : > { %2394 = vmatprep.subr.bf16.mxu1 %v2393_v4  ;;  %v412_v4 = vrot.slane %v3282_v42, %v411_v2  ;;  %v1222_v2 = vld [vmem:[%s2924_s29 + $0x538] sm:$0xff] }
  0xbc   : > { %851 = vxpose.xlu1.b32.cont [12/16] (narrow) %v723_v15, 56  ;;  %v764_v15 = vld [vmem:[%s2919_s27 + $0x2a0] sm:$0xff] }
  0xbd   : > { %885 = vxpose.xlu0.b32.cont [14/16] (narrow) %v741_v34, 56  ;;  %v757_v34 = vld [vmem:[%s2919_s27 + $0x268] sm:$0xff] }
  0xc0   : > { %852 = vxpose.xlu1.b32.cont [13/16] (narrow) %v724_v25, 56  ;;  %v769_v25 = vld [vmem:[%s2919_s27 + $0x2c8] sm:$0xff] }
  0xc1   : > { %886 = vxpose.xlu0.b32.cont [15/16] (narrow) %v742_v48, 56 }
  0xc4   : > { %853 = vxpose.xlu1.b32.cont [14/16] (narrow) %v725_v35, 56  ;;  %v774_v35 = vld [vmem:[%s2919_s27 + $0x2f0] sm:$0xff] }
  0xc5   : > { %887 = vxpose.xlu0.b32.end [16/16] (narrow) %v743_v61, 56 }
  0xc8   : > { %854 = vxpose.xlu1.b32.cont [15/16] (narrow) %v726_v51, 56 }
  0xc9   : > { %936 = vxpose.xlu0.b32.start [1/16] (narrow) %v760_v8, 56  ;;  %v824_v46 = vpop.trf.xlu0 }
  0xcc   : > { %855 = vxpose.xlu1.b32.end [16/16] (narrow) %v727_v0, 56  ;;  %v407_v0 = vsub.s32 2, %v3272_v40 }
  0xcd   : > { %937 = vxpose.xlu0.b32.cont [2/16] (narrow) %v761_v9, 56  ;;  %v825_v55 = vpop.trf.xlu0 }
  0xce   : > { %v408_v49 = vrot.slane %v3282_v42, %v407_v0  ;;  %v1219_v0 = vld [vmem:[%s2924_s29 + $0x520] sm:$0xff] }
  0xd0   : > { %904 = vxpose.xlu1.b32.start [1/16] (narrow) %v744_v7, 56  ;;  %v792_v48 = vpop.trf.xlu1 }
  0xd1   : > { %938 = vxpose.xlu0.b32.cont [3/16] (narrow) %v762_v11, 56  ;;  %v3290_v57 = vpop.trf.xlu0 }
  0xd4   : > { %905 = vxpose.xlu1.b32.cont [2/16] (narrow) %v745_v10, 56  ;;  %v3288_v56 = vpop.trf.xlu1 }
  0xd5   : > { %939 = vxpose.xlu0.b32.cont [4/16] (narrow) %v763_v13, 56  ;;  %v3294_v62 = vpop.trf.xlu0 }
  0xd8   : > { %906 = vxpose.xlu1.b32.cont [3/16] (narrow) %v746_v12, 56  ;;  %v3292_v58 = vpop.trf.xlu1 }
  0xd9   : > { %940 = vxpose.xlu0.b32.cont [5/16] (narrow) %v764_v15, 56  ;;  %v3301_v3 = vpop.trf.xlu0 }
  0xdc   : > { %907 = vxpose.xlu1.b32.cont [4/16] (narrow) %v747_v14, 56  ;;  %v3297_v1 = vpop.trf.xlu1  ;;  %v1151_v14 = vld [vmem:[%s2924_s29 + $0x300] sm:$0xff] }
  0xdd   : > { %941 = vxpose.xlu0.b32.cont [6/16] (narrow) %v765_v17, 56  ;;  %v3306_v12 = vpop.trf.xlu0  ;;  %v1154_v17 = vld [vmem:[%s2924_s29 + $0x318] sm:$0xff] }
  0xe0   : > { %908 = vxpose.xlu1.b32.cont [5/16] (narrow) %v748_v16, 56  ;;  %v3304_v5 = vpop.trf.xlu1 }
  0xe1   : > { %942 = vxpose.xlu0.b32.cont [7/16] (narrow) %v766_v19, 56  ;;  %v1156_v19 = vld [vmem:[%s2924_s29 + $0x328] sm:$0xff] }
  0xe4   : > { %909 = vxpose.xlu1.b32.cont [6/16] (narrow) %v749_v18, 56  ;;  %v1153_v18 = vld [vmem:[%s2924_s29 + $0x310] sm:$0xff] }
  0xe5   : > { %943 = vxpose.xlu0.b32.cont [8/16] (narrow) %v767_v21, 56  ;;  %v3318_v21 = vpop.trf.xlu1 }
  0xe8   : > { %910 = vxpose.xlu1.b32.cont [7/16] (narrow) %v750_v20, 56 }
  0xe9   : > { %944 = vxpose.xlu0.b32.cont [9/16] (narrow) %v768_v23, 56  ;;  %v1161_v23 = vld [vmem:[%s2924_s29 + $0x350] sm:$0xff] }
  0xec   : > { %911 = vxpose.xlu1.b32.cont [8/16] (narrow) %v751_v22, 56  ;;  %v1158_v22 = vld [vmem:[%s2924_s29 + $0x338] sm:$0xff] }
  0xed   : > { %945 = vxpose.xlu0.b32.cont [10/16] (narrow) %v769_v25, 56  ;;  %v1210_v25 = vld [vmem:[%s2924_s29 + $0x4d8] sm:$0xff] }
  0xf0   : > { %912 = vxpose.xlu1.b32.cont [9/16] (narrow) %v752_v24, 56  ;;  %v1207_v24 = vld [vmem:[%s2924_s29 + $0x4c0] sm:$0xff] }
  0xf1   : > { %946 = vxpose.xlu0.b32.cont [11/16] (narrow) %v770_v27, 56  ;;  %v2395_v27 = vpack.c.bf16 %v1154_v17, %v1151_v14  ;;  %v2565_v17 = vpack.c.bf16 %v1222_v2, %v1219_v0  ;;  %v1191_v0 = vld [vmem:[%s2924_s29 + $0x440] sm:$0xff]  ;;  %v1240_v2 = vld [vmem:[%s2924_s29 + $0x5c8] sm:$0xff] }
  0xf4   : > { %913 = vxpose.xlu1.b32.cont [10/16] (narrow) %v753_v26, 56 }
  0xf5   : > { %947 = vxpose.xlu0.b32.cont [12/16] (narrow) %v771_v29, 56  ;;  %v1157_v29 = vld [vmem:[%s2924_s29 + $0x330] sm:$0xff] }
  0xf8   : > { %914 = vxpose.xlu1.b32.cont [11/16] (narrow) %v754_v28, 56  ;;  %v2555_v28 = vpack.c.bf16 %v1156_v19, %v1153_v18  ;;  %v1176_v18 = vld [vmem:[%s2924_s29 + $0x3c8] sm:$0xff]  ;;  %v419_v19 = vsub.s32 5, %v3272_v40 }
  0xf9   : > { %948 = vxpose.xlu0.b32.cont [13/16] (narrow) %v772_v31, 56  ;;  %v1160_v31 = vld [vmem:[%s2924_s29 + $0x348] sm:$0xff] }
  0xfc   : > { %915 = vxpose.xlu1.b32.cont [12/16] (narrow) %v755_v30, 56 }
  0xfd   : > { %949 = vxpose.xlu0.b32.cont [14/16] (narrow) %v773_v33, 56  ;;  %v1162_v33 = vld [vmem:[%s2924_s29 + $0x358] sm:$0xff] }
 0x100   : > { %916 = vxpose.xlu1.b32.cont [13/16] (narrow) %v756_v32, 56  ;;  %v1159_v32 = vld [vmem:[%s2924_s29 + $0x340] sm:$0xff] }
 0x101   : > { %950 = vxpose.xlu0.b32.cont [15/16] (narrow) %v774_v35, 56  ;;  %v2397_v35 = vpack.c.bf16 %v1161_v23, %v1158_v22  ;;  %v1179_v22 = vld [vmem:[%s2924_s29 + $0x3e0] sm:$0xff]  ;;  %v1225_v23 = vld [vmem:[%s2924_s29 + $0x550] sm:$0xff] }
 0x104   : > { %917 = vxpose.xlu1.b32.cont [14/16] (narrow) %v757_v34, 56  ;;  %v3330_v34 = vpop.trf.xlu0 }
 0x105   : > { %951 = vxpose.xlu0.b32.end [16/16] (narrow) %v775_v37, 56  ;;  %v1164_v37 = vld [vmem:[%s2924_s29 + $0x368] sm:$0xff] }
 0x108   : > { %918 = vxpose.xlu1.b32.cont [15/16] (narrow) %v758_v36, 56  ;;  %v2557_v36 = vpack.c.bf16 %v1210_v25, %v1207_v24  ;;  %v1228_v24 = vld [vmem:[%s2924_s29 + $0x568] sm:$0xff] }
 0x10c   : > { %919 = vxpose.xlu1.b32.end [16/16] (narrow) %v759_v38, 56 }
 0x12d   : > { %v497_v47 = vpop.f32.mrb[0].mxu0 }
 0x12e   : > { %v498_v50 = vadd.f32 %v497_v47, %v400_v44  ;;  %v499_v51 = vpop.f32.mrb[1].mxu0  ;;  %v1216_v44 = vld [vmem:[%s2924_s29 + $0x508] sm:$0xff]  ;;  %v2559_v47 = vpack.c.bf16 %v1162_v33, %v1159_v32  ;;  %v415_v32 = vsub.s32 4, %v3272_v40  ;;  %v2409_v33 = vpack.c.bf16 %v1179_v22, %v1176_v18  ;;  %v1185_v40 = vld [vmem:[%s2924_s29 + $0x410] sm:$0xff]  ;;  %v1243_v22 = vld [vmem:[%s2924_s29 + $0x5e0] sm:$0xff] }
 0x12f   : > { %v500_v52 = vadd.f32 %v499_v51, %v404_v45  ;;  %v3337_v45 = vpop.trf.xlu1  ;;  %v1166_v51 = vld [vmem:[%s2924_s29 + $0x378] sm:$0xff] }
 0x130   : > { %v2089_v53 = vmul.f32 -1.442695, %v498_v50 }
 0x131   : > { %v2090_v54 = vmul.f32 -1.442695, %v500_v52  ;;  %v1165_v52 = vld [vmem:[%s2924_s29 + $0x370] sm:$0xff] }
 0x132   : > { %2692 = vpow2.f32 %v2089_v53  ;;  %v1168_v53 = vld [vmem:[%s2924_s29 + $0x388] sm:$0xff] }
 0x133   : > { %2694 = vpow2.f32 %v2090_v54  ;;  %v2401_v54 = vpack.c.bf16 %v1167_v39, %v1164_v37  ;;  %v420_v37 = vrot.slane %v3282_v42, %v419_v19  ;;  %v1231_v39 = vld [vmem:[%s2924_s29 + $0x580] sm:$0xff] }
 0x13c   : > { %v2693_v59 = vpop.eup %2692 }
 0x13d   : > { %v2695_v60 = vpop.eup %2694  ;;  %v662_v61 = vadd.f32 1.0, %v2693_v59  ;;  %v1170_v59 = vld [vmem:[%s2924_s29 + $0x398] sm:$0xff] }
 0x13e   : > { %v663_v63 = vadd.f32 1.0, %v2695_v60  ;;  %v3346_v60 = vpop.trf.xlu0 }
 0x13f   : > { %2696 = vrcp.f32 %v662_v61 }
 0x140   : > { %2698 = vrcp.f32 %v663_v63  ;;  %v1173_v63 = vld [vmem:[%s2924_s29 + $0x3b0] sm:$0xff] }
 0x145   : > { %v568_v8 = vpop.f32.mrb[2].mxu0 }
 0x146   : > { %v569_v6 = vadd.f32 %v568_v8, %v408_v49  ;;  %v570_v7 = vpop.f32.mrb[3].mxu0  ;;  %v2563_v8 = vpack.c.bf16 %v1168_v53, %v1165_v52  ;;  %v1186_v52 = vld [vmem:[%s2924_s29 + $0x418] sm:$0xff]  ;;  %v416_v53 = vrot.slane %v3282_v42, %v415_v32  ;;  %v1237_v42 = vld [vmem:[%s2924_s29 + $0x5b0] sm:$0xff]  ;;  %v1195_v32 = vld [vmem:[%s2924_s29 + $0x460] sm:$0xff] }
 0x147   : > { %v571_v9 = vadd.f32 %v570_v7, %v412_v4  ;;  %v3354_v7 = vpop.trf.xlu1  ;;  %v2577_v19 = vpack.c.bf16 %v1240_v2, %v1237_v42  ;;  %v1208_v42 = vld [vmem:[%s2924_s29 + $0x4c8] sm:$0xff]  ;;  %v1255_v2 = vld [vmem:[%s2924_s29 + $0x640] sm:$0xff] }
 0x148   : > { %v2091_v10 = vmul.f32 -1.442695, %v569_v6  ;;  %v1169_v6 = vld [vmem:[%s2924_s29 + $0x390] sm:$0xff] }
 0x149   : > { %v2697_v11 = vpop.eup %2696  ;;  %v2092_v13 = vmul.f32 -1.442695, %v571_v9 }
 0x14a   : > { %v2699_v15 = vpop.eup %2698  ;;  %v3310_v16 = vrot.slane %v2697_v11, %v3275_v41  ;;  %2700 = vpow2.f32 %v2091_v10  ;;  %v1172_v10 = vld [vmem:[%s2924_s29 + $0x3a8] sm:$0xff]  ;;  %v1171_v11 = vld [vmem:[%s2924_s29 + $0x3a0] sm:$0xff] }
 0x14b   : > { %v3316_v20 = vrot.slane %v2699_v15, %v3275_v41  ;;  %2702 = vpow2.f32 %v2092_v13  ;;  %v1174_v13 = vld [vmem:[%s2924_s29 + $0x3b8] sm:$0xff]  ;;  %v2405_v15 = vpack.c.bf16 %v1173_v63, %v1170_v59  ;;  %v2407_v25 = vpack.c.bf16 %v1172_v10, %v1169_v6 }
 0x14c   : > { %v992_v30 = vmul.f32 %v3310_v16, %v792_v48  ;;  %v1163_v48 = vld [vmem:[%s2924_s29 + $0x360] sm:$0xff]  ;;  %v998_v50 = vmul.f32 %v3310_v16, %v3288_v56  ;;  %v1190_v6 = vld [vmem:[%s2924_s29 + $0x438] sm:$0xff]  ;;  %v1022_v10 = vmul.f32 %v3310_v16, %v3318_v21 }
 0x14d   : > { %v993_v26 = vmul.f32 %v3316_v20, %v824_v46  ;;  %v999_v38 = vmul.f32 %v3316_v20, %v825_v55  ;;  %v2399_v46 = vpack.c.bf16 %v1160_v31, %v1157_v29  ;;  %v2561_v55 = vpack.c.bf16 %v1216_v44, %v1213_v43  ;;  %v1178_v29 = vld [vmem:[%s2924_s29 + $0x3d8] sm:$0xff]  ;;  %v1180_v31 = vld [vmem:[%s2924_s29 + $0x3e8] sm:$0xff] }
 0x14e   : > { %v1005_v56 = vmul.f32 %v3316_v20, %v3290_v57  ;;  %v2403_v4 = vpack.c.bf16 %v1166_v51, %v1163_v48  ;;  %v1004_v57 = vmul.f32 %v3310_v16, %v3292_v58  ;;  %v1011_v58 = vmul.f32 %v3316_v20, %v3294_v62  ;;  %v1234_v43 = vld [vmem:[%s2924_s29 + $0x598] sm:$0xff]  ;;  %v1183_v51 = vld [vmem:[%s2924_s29 + $0x400] sm:$0xff] }
 0x14f   : > { %1407 = vmatprep.mubr.f32.mxu1 %v993_v26  ;;  %1728 = vmatprep.mubr.f32.mxu0 %v993_v26  ;;  %v2567_v26 = vpack.c.bf16 %v1174_v13, %v1171_v11  ;;  %v1010_v62 = vmul.f32 %v3310_v16, %v3297_v1  ;;  %v3379_v1 = vpop.trf.xlu1  ;;  %v2573_v59 = vpack.c.bf16 %v1234_v43, %v1231_v39  ;;  %v1189_v11 = vld [vmem:[%s2924_s29 + $0x430] sm:$0xff]  ;;  %v1192_v13 = vld [vmem:[%s2924_s29 + $0x448] sm:$0xff] }
 0x150   : > { %1408 = vmatmul.mubr.f32.vlgmr.msra.gmra.mrb[0].mxu1 %v992_v30  ;;  %1729 = vmatmul.mubr.f32.vlgmr.msra.gmra.mrb[6].mxu0 %v992_v30  ;;  %v1177_v30 = vld [vmem:[%s2924_s29 + $0x3d0] sm:$0xff]  ;;  %v1023_v63 = vmul.f32 %v3316_v20, %v3306_v12  ;;  %v1029_v21 = vmul.f32 %v3316_v20, %v3330_v34 }
 0x151   : > { %2396 = vmatpush1.bf16.msra.mxu1 %v2395_v27  ;;  %2556 = vmatpush3.bf16.msra.mxu0 %v2555_v28  ;;  %v1175_v27 = vld [vmem:[%s2924_s29 + $0x3c0] sm:$0xff]  ;;  %v3369_v28 = vpop.trf.xlu0 }
 0x152   : > { %1413 = vmatprep.mubr.f32.mxu1 %v999_v38  ;;  %1733 = vmatprep.mubr.f32.mxu0 %v999_v38  ;;  %v1017_v38 = vmul.f32 %v3316_v20, %v3301_v3  ;;  %v2411_v44 = vpack.c.bf16 %v1178_v29, %v1175_v27  ;;  %v1184_v3 = vld [vmem:[%s2924_s29 + $0x408] sm:$0xff]  ;;  %v1193_v27 = vld [vmem:[%s2924_s29 + $0x450] sm:$0xff]  ;;  %v1028_v20 = vmul.f32 %v3310_v16, %v3337_v45 }
 0x153   : > { %2398 = vmatprep.subr.bf16.mxu1 %v2397_v35  ;;  %2558 = vmatprep.subr.bf16.mxu0 %v2557_v36  ;;  %v2569_v35 = vpack.c.bf16 %v1228_v24, %v1225_v23  ;;  %v1182_v36 = vld [vmem:[%s2924_s29 + $0x3f8] sm:$0xff] }
 0x154   : > { %v2701_v61 = vpop.eup %2700  ;;  %1414 = vmatmul.mubr.f32.gmra.mrb[2].mxu1 %v998_v50  ;;  %1734 = vmatmul.mubr.f32.gmra.mrb[8].mxu0 %v998_v50  ;;  %v1016_v50 = vmul.f32 %v3310_v16, %v3304_v5  ;;  %v1246_v23 = vld [vmem:[%s2924_s29 + $0x5f8] sm:$0xff] }
 0x155   : > { %v2703_v49 = vpop.eup %2702  ;;  %2400 = vmatpush1.bf16.msra.mxu1 %v2399_v46  ;;  %2560 = vmatpush3.bf16.msra.mxu0 %v2559_v47  ;;  %v664_v14 = vadd.f32 1.0, %v2701_v61  ;;  %v2571_v46 = vpack.c.bf16 %v1180_v31, %v1177_v30  ;;  %v1181_v47 = vld [vmem:[%s2924_s29 + $0x3f0] sm:$0xff]  ;;  %v1188_v61 = vld [vmem:[%s2924_s29 + $0x428] sm:$0xff]  ;;  %v3394_v5 = vpop.trf.xlu0  ;;  %v2581_v30 = vpack.c.bf16 %v1246_v23, %v1243_v22 }
 0x156   : > { %v665_v9 = vadd.f32 1.0, %v2703_v49  ;;  %1419 = vmatprep.mubr.f32.mxu1 %v1005_v56  ;;  %1738 = vmatprep.mubr.f32.mxu0 %v1005_v56  ;;  %v2415_v49 = vpack.c.bf16 %v1184_v3, %v1181_v47  ;;  %v2417_v18 = vpack.c.bf16 %v1191_v0, %v1188_v61  ;;  %v1202_v47 = vld [vmem:[%s2924_s29 + $0x498] sm:$0xff]  ;;  %v1261_v22 = vld [vmem:[%s2924_s29 + $0x670] sm:$0xff]  ;;  %v1264_v23 = vld [vmem:[%s2924_s29 + $0x688] sm:$0xff] }
 0x157   : > { %2402 = vmatprep.subr.bf16.mxu1 %v2401_v54  ;;  %2562 = vmatprep.subr.bf16.mxu0 %v2561_v55  ;;  %v2413_v55 = vpack.c.bf16 %v1185_v40, %v1182_v36  ;;  %v1300_v40 = vld [vmem:[%s2924_s29 + $0x7a8] sm:$0xff]  ;;  %v1206_v3 = vld [vmem:[%s2924_s29 + $0x4b8] sm:$0xff] }
 0x158   : > { %2704 = vrcp.f32 %v665_v9  ;;  %1420 = vmatmul.mubr.f32.gmra.mrb[4].mxu1 %v1004_v57  ;;  %1739 = vmatmul.mubr.f32.gmra.mrb[10].mxu0 %v1004_v57  ;;  %v3403_v9 = vpop.trf.xlu1 }
 0x159   : > { %2404 = vmatpush1.bf16.msra.mxu1 %v2403_v4  ;;  %2564 = vmatpush3.bf16.msra.mxu0 %v2563_v8  ;;  %2706 = vrcp.f32 %v664_v14  ;;  %v2575_v4 = vpack.c.bf16 %v1186_v52, %v1183_v51  ;;  %v1187_v8 = vld [vmem:[%s2924_s29 + $0x420] sm:$0xff]  ;;  %v1194_v14 = vld [vmem:[%s2924_s29 + $0x458] sm:$0xff]  ;;  %v3420_v29 = vpop.trf.xlu0  ;;  %v1209_v51 = vld [vmem:[%s2924_s29 + $0x4d0] sm:$0xff] }
 0x15a   : > { %1425 = vmatprep.mubr.f32.mxu1 %v1011_v58  ;;  %1743 = vmatprep.mubr.f32.mxu0 %v1011_v58  ;;  %v1197_v58 = vld [vmem:[%s2924_s29 + $0x470] sm:$0xff] }
 0x15b   : > { %2406 = vmatprep.subr.bf16.mxu1 %v2405_v15  ;;  %2566 = vmatprep.subr.bf16.mxu0 %v2565_v17  ;;  %v2421_v34 = vpack.c.bf16 %v1197_v58, %v1194_v14  ;;  %v1211_v14 = vld [vmem:[%s2924_s29 + $0x4e0] sm:$0xff]  ;;  %v1214_v58 = vld [vmem:[%s2924_s29 + $0x4f8] sm:$0xff] }
 0x15c   : > { %1426 = vmatmul.mubr.f32.gmra.mrb[6].mxu1 %v1010_v62  ;;  %1744 = vmatmul.mubr.f32.gmra.mrb[12].mxu0 %v1010_v62  ;;  %v1196_v62 = vld [vmem:[%s2924_s29 + $0x468] sm:$0xff]  ;;  %v3432_v16 = vpop.trf.xlu1 }
 0x15d   : > { %2408 = vmatpush1.bf16.msra.mxu1 %v2407_v25  ;;  %2568 = vmatpush3.bf16.msra.mxu0 %v2567_v26  ;;  %v639_v48 = vpop.f32.mrb[4].mxu0  ;;  %v2419_v25 = vpack.c.bf16 %v1190_v6, %v1187_v8  ;;  %v2579_v26 = vpack.c.bf16 %v1192_v13, %v1189_v11  ;;  %v2423_v39 = vpack.c.bf16 %v1196_v62, %v1193_v27  ;;  %v3443_v52 = vpop.trf.xlu0  ;;  %v1212_v6 = vld [vmem:[%s2924_s29 + $0x4e8] sm:$0xff]  ;;  %v1315_v62 = vld [vmem:[%s2924_s29 + $0x820] sm:$0xff] }
 0x15e   : > { %1431 = vmatprep.mubr.f32.mxu1 %v1017_v38  ;;  %1748 = vmatprep.mubr.f32.mxu0 %v1017_v38  ;;  %v641_v54 = vpop.f32.mrb[5].mxu0  ;;  %v640_v15 = vadd.f32 %v639_v48, %v416_v53  ;;  %v1297_v38 = vld [vmem:[%s2924_s29 + $0x790] sm:$0xff] }
 0x15f   : > { %2410 = vmatprep.subr.bf16.mxu1 %v2409_v33  ;;  %2570 = vmatprep.subr.bf16.mxu0 %v2569_v35  ;;  %v642_v56 = vadd.f32 %v641_v54, %v420_v37  ;;  %v1198_v33 = vld [vmem:[%s2924_s29 + $0x478] sm:$0xff]  ;;  %v1200_v35 = vld [vmem:[%s2924_s29 + $0x488] sm:$0xff]  ;;  %v1203_v37 = vld [vmem:[%s2924_s29 + $0x4a0] sm:$0xff] }
 0x160   : > { %1432 = vmatmul.mubr.f32.gmra.mrb[8].mxu1 %v1016_v50  ;;  %1749 = vmatmul.mubr.f32.gmra.mrb[14].mxu0 %v1016_v50  ;;  %v2093_v31 = vmul.f32 -1.442695, %v640_v15  ;;  %v2583_v43 = vpack.c.bf16 %v1198_v33, %v1195_v32  ;;  %v1249_v48 = vld [vmem:[%s2924_s29 + $0x610] sm:$0xff]  ;;  %v1252_v50 = vld [vmem:[%s2924_s29 + $0x628] sm:$0xff]  ;;  %v1303_v54 = vld [vmem:[%s2924_s29 + $0x7c0] sm:$0xff] }
 0x161   : > { %2412 = vmatpush1.bf16.msra.mxu1 %v2411_v44  ;;  %2572 = vmatpush3.bf16.msra.mxu0 %v2571_v46  ;;  %v2094_v57 = vmul.f32 -1.442695, %v642_v56  ;;  %v2425_v44 = vpack.c.bf16 %v1203_v37, %v1200_v35  ;;  %v2585_v46 = vpack.c.bf16 %v1300_v40, %v1297_v38  ;;  %v2587_v61 = vpack.c.bf16 %v1252_v50, %v1249_v48  ;;  %v1205_v56 = vld [vmem:[%s2924_s29 + $0x4b0] sm:$0xff]  ;;  %v3471_v15 = vpop.trf.xlu0  ;;  %v1220_v33 = vld [vmem:[%s2924_s29 + $0x528] sm:$0xff]  ;;  %v1267_v35 = vld [vmem:[%s2924_s29 + $0x6a0] sm:$0xff] }
 0x162   : > { %v2705_v12 = vpop.eup %2704  ;;  %1437 = vmatprep.mubr.f32.mxu1 %v1023_v63  ;;  %1753 = vmatprep.mubr.f32.mxu0 %v1023_v63  ;;  %v3452_v63 = vpop.trf.xlu1  ;;  %v2431_v11 = vpack.c.bf16 %v1208_v42, %v1205_v56  ;;  %v1224_v40 = vld [vmem:[%s2924_s29 + $0x548] sm:$0xff]  ;;  %v1223_v48 = vld [vmem:[%s2924_s29 + $0x540] sm:$0xff]  ;;  %v1233_v56 = vld [vmem:[%s2924_s29 + $0x590] sm:$0xff] }
 0x163   : > { %v3411_v17 = vrot.slane %v2705_v12, %v3275_v41  ;;  %2414 = vmatprep.subr.bf16.mxu1 %v2413_v55  ;;  %2574 = vmatprep.subr.bf16.mxu0 %v2573_v59  ;;  %v2707_v24 = vpop.eup %2706  ;;  %2708 = vpow2.f32 %v2094_v57  ;;  %v1306_v55 = vld [vmem:[%s2924_s29 + $0x7d8] sm:$0xff]  ;;  %v1215_v57 = vld [vmem:[%s2924_s29 + $0x500] sm:$0xff] }
 0x164   : > { %1438 = vmatmul.mubr.f32.gmra.mrb[10].mxu1 %v1022_v10  ;;  %1754 = vmatmul.mubr.f32.gmra.mrb[16].mxu0 %v1022_v10  ;;  %v3435_v45 = vrot.slane %v2707_v24, %v3275_v41  ;;  %2710 = vpow2.f32 %v2093_v31  ;;  %v2589_v8 = vpack.c.bf16 %v1306_v55, %v1303_v54  ;;  %v1312_v10 = vld [vmem:[%s2924_s29 + $0x808] sm:$0xff]  ;;  %v1218_v24 = vld [vmem:[%s2924_s29 + $0x518] sm:$0xff]  ;;  %v1217_v31 = vld [vmem:[%s2924_s29 + $0x510] sm:$0xff] }
 0x165   : > { %2416 = vmatpush1.bf16.msra.mxu1 %v2415_v49  ;;  %2576 = vmatpush3.bf16.msra.mxu0 %v2575_v4  ;;  %v995_v36 = vmul.f32 %v3411_v17, %v3346_v60  ;;  %v1199_v60 = vld [vmem:[%s2924_s29 + $0x480] sm:$0xff]  ;;  %v3456_v0 = vmul.f32 %v3411_v17, %v3369_v28  ;;  %v1258_v49 = vld [vmem:[%s2924_s29 + $0x658] sm:$0xff]  ;;  %v1309_v28 = vld [vmem:[%s2924_s29 + $0x7f0] sm:$0xff]  ;;  %v3496_v32 = vmul.f32 %v3411_v17, %v3420_v29 }
 0x166   : > { %1443 = vmatprep.mubr.f32.mxu1 %v1029_v21  ;;  %1758 = vmatprep.mubr.f32.mxu0 %v1029_v21  ;;  %v3447_v53 = vmul.f32 %v3435_v45, %v3354_v7  ;;  %v2427_v59 = vpack.c.bf16 %v1202_v47, %v1199_v60  ;;  %v2429_v7 = vpack.c.bf16 %v1209_v51, %v1206_v3  ;;  %v1321_v60 = vld [vmem:[%s2924_s29 + $0x850] sm:$0xff]  ;;  %v1226_v51 = vld [vmem:[%s2924_s29 + $0x558] sm:$0xff]  ;;  %v1276_v55 = vld [vmem:[%s2924_s29 + $0x6e8] sm:$0xff] }
 0x167   : > { %2418 = vmatprep.subr.bf16.mxu1 %v2417_v18  ;;  %2578 = vmatprep.subr.bf16.mxu0 %v2577_v19  ;;  %v3466_v12 = vmul.f32 %v3435_v45, %v3379_v1  ;;  %v2591_v13 = vpack.c.bf16 %v1258_v49, %v1255_v2  ;;  %v3476_v1 = vmul.f32 %v3411_v17, %v3394_v5  ;;  %v1273_v54 = vld [vmem:[%s2924_s29 + $0x6d0] sm:$0xff]  ;;  %v1327_v42 = vld [vmem:[%s2924_s29 + $0x880] sm:$0xff]  ;;  %v1330_v2 = vld [vmem:[%s2924_s29 + $0x898] sm:$0xff] }
 0x168   : > { %1444 = vmatmul.mubr.f32.gmra.mrb[12].mxu1 %v1028_v20  ;;  %1759 = vmatmul.mubr.f32.gmra.mrb[18].mxu0 %v1028_v20  ;;  %v2433_v19 = vpack.c.bf16 %v1215_v57, %v1212_v6  ;;  %v2593_v21 = vpack.c.bf16 %v1312_v10, %v1309_v28  ;;  %v3488_v5 = vmul.f32 %v3435_v45, %v3403_v9  ;;  %v1318_v20 = vld [vmem:[%s2924_s29 + $0x838] sm:$0xff]  ;;  %v1232_v28 = vld [vmem:[%s2924_s29 + $0x588] sm:$0xff]  ;;  %v1279_v10 = vld [vmem:[%s2924_s29 + $0x700] sm:$0xff] }
 0x169   : > { %2420 = vmatpush1.bf16.msra.mxu1 %v2419_v25  ;;  %2580 = vmatpush3.bf16.msra.mxu0 %v2579_v26  ;;  %v1221_v25 = vld [vmem:[%s2924_s29 + $0x530] sm:$0xff]  ;;  %v3483_v26 = vpop.trf.xlu1  ;;  %v2597_v38 = vpack.c.bf16 %v1318_v20, %v1315_v62  ;;  %v3506_v29 = vmul.f32 %v3435_v45, %v3432_v16  ;;  %v3514_v3 = vmul.f32 %v3411_v17, %v3443_v52 }
 0x16a   : > { %2422 = vmatprep.subr.bf16.mxu1 %v2421_v34  ;;  %2582 = vmatprep.subr.bf16.mxu0 %v2581_v30  ;;  %v2435_v34 = vpack.c.bf16 %v1214_v58, %v1211_v14  ;;  %v2595_v30 = vpack.c.bf16 %v1264_v23, %v1261_v22  ;;  %v2437_v9 = vpack.c.bf16 %v1221_v25, %v1218_v24  ;;  %v1236_v14 = vld [vmem:[%s2924_s29 + $0x5a8] sm:$0xff]  ;;  %v1333_v58 = vld [vmem:[%s2924_s29 + $0x8b0] sm:$0xff]  ;;  %v1235_v24 = vld [vmem:[%s2924_s29 + $0x5a0] sm:$0xff] }
 0x16b   : > { %1828 = vmatprep.mubr.f32.mxu0 %v995_v36  ;;  %1514 = vmatprep.mubr.f32.mxu1 %v995_v36  ;;  %v1270_v36 = vld [vmem:[%s2924_s29 + $0x6b8] sm:$0xff]  ;;  %v3526_v52 = vmul.f32 %v3435_v45, %v3452_v63  ;;  %v2443_v49 = vpack.c.bf16 %v1226_v51, %v1223_v48  ;;  %v3536_v57 = vmul.f32 %v3411_v17, %v3471_v15  ;;  %v1336_v22 = vld [vmem:[%s2924_s29 + $0x8c8] sm:$0xff]  ;;  %v1285_v20 = vld [vmem:[%s2924_s29 + $0x730] sm:$0xff] }
 0x16c   : > { %v2599_v47 = vpack.c.bf16 %v1270_v36, %v1267_v35  ;;  %v3546_v15 = vmul.f32 %v3435_v45, %v3483_v26  ;;  %v1238_v25 = vld [vmem:[%s2924_s29 + $0x5b8] sm:$0xff]  ;;  %v1339_v35 = vld [vmem:[%s2924_s29 + $0x8e0] sm:$0xff] }
 0x16d   : > { %2424 = vmatpush1.bf16.msra.mxu1 %v2423_v39  ;;  %2584 = vmatpush3.bf16.msra.mxu0 %v2583_v43  ;;  %v2709_v4 = vpop.eup %2708  ;;  %v1227_v39 = vld [vmem:[%s2924_s29 + $0x560] sm:$0xff]  ;;  %v894_v43 = vpop.trf.xlu0  ;;  %v1342_v36 = vld [vmem:[%s2924_s29 + $0x8f8] sm:$0xff] }
 0x16e   : > { %2426 = vmatprep.subr.bf16.mxu1 %v2425_v44  ;;  %2586 = vmatprep.subr.bf16.mxu0 %v2585_v46  ;;  %v667_v18 = vadd.f32 1.0, %v2709_v4  ;;  %v2711_v27 = vpop.eup %2710  ;;  %v1324_v44 = vld [vmem:[%s2924_s29 + $0x868] sm:$0xff]  ;;  %v2439_v46 = vpack.c.bf16 %v1220_v33, %v1217_v31  ;;  %v862_v50 = vpop.trf.xlu1  ;;  %v2441_v16 = vpack.c.bf16 %v1227_v39, %v1224_v40  ;;  %v2603_v4 = vpack.c.bf16 %v1276_v55, %v1273_v54  ;;  %v1245_v33 = vld [vmem:[%s2924_s29 + $0x5f0] sm:$0xff]  ;;  %v1294_v48 = vld [vmem:[%s2924_s29 + $0x778] sm:$0xff] }
 0x16f   : > { %v666_v37 = vadd.f32 1.0, %v2711_v27  ;;  %v3554_v62 = vmul.f32 %v3411_v17, %v894_v43  ;;  %v3567_v17 = vmul.f32 %v3435_v45, %v862_v50  ;;  %v2451_v40 = vpack.c.bf16 %v1238_v25, %v1235_v24  ;;  %v1241_v43 = vld [vmem:[%s2924_s29 + $0x5d0] sm:$0xff]  ;;  %v1248_v50 = vld [vmem:[%s2924_s29 + $0x608] sm:$0xff]  ;;  %v1266_v24 = vld [vmem:[%s2924_s29 + $0x698] sm:$0xff] }
 0x170   : > { %1829 = vmatmul.mubr.f32.vlgmr.msra.gmra.mrb[20].mxu0 %v3447_v53  ;;  %2712 = vrcp.f32 %v667_v18  ;;  %v1239_v18 = vld [vmem:[%s2924_s29 + $0x5c0] sm:$0xff]  ;;  %v1269_v25 = vld [vmem:[%s2924_s29 + $0x6b0] sm:$0xff] }
 0x171   : > { %2428 = vmatpush1.bf16.msra.mxu1 %v2427_v59  ;;  %2588 = vmatpush3.bf16.msra.mxu0 %v2587_v61  ;;  %2714 = vrcp.f32 %v666_v37  ;;  %v2601_v59 = vpack.c.bf16 %v1324_v44, %v1321_v60  ;;  %v1230_v61 = vld [vmem:[%s2924_s29 + $0x578] sm:$0xff]  ;;  %v2449_v26 = vpack.c.bf16 %v1239_v18, %v1236_v14  ;;  %v2613_v44 = vpack.c.bf16 %v1342_v36, %v1339_v35  ;;  %v1263_v14 = vld [vmem:[%s2924_s29 + $0x680] sm:$0xff] }
 0x172   : > { %1833 = vmatprep.mubr.f32.mxu0 %v3456_v0  ;;  %2430 = vmatprep.subr.bf16.mxu1 %v2429_v7  ;;  %v3521_v7 = vpop.trf.xlu0  ;;  %v3531_v6 = vpop.trf.xlu1  ;;  %v2445_v63 = vpack.c.bf16 %v1233_v56, %v1230_v61 }
 0x173   : > { %2590 = vmatprep.subr.bf16.mxu0 %v2589_v8  ;;  %v1229_v8 = vld [vmem:[%s2924_s29 + $0x570] sm:$0xff] }
 0x174   : > { %1834 = vmatmul.mubr.f32.gmra.mrb[22].mxu0 %v3466_v12  ;;  %v2447_v23 = vpack.c.bf16 %v1232_v28, %v1229_v8 }
 0x175   : > { %2432 = vmatpush1.bf16.msra.mxu1 %v2431_v11  ;;  %2592 = vmatpush3.bf16.msra.mxu0 %v2591_v13  ;;  %v1282_v11 = vld [vmem:[%s2924_s29 + $0x718] sm:$0xff]  ;;  %v2605_v13 = vpack.c.bf16 %v1330_v2, %v1327_v42  ;;  %v1257_v2 = vld [vmem:[%s2924_s29 + $0x650] sm:$0xff] }
 0x176   : > { %1838 = vmatprep.mubr.f32.mxu0 %v3476_v1  ;;  %2434 = vmatprep.subr.bf16.mxu1 %v2433_v19  ;;  %v953_v27 = vpop.trf.xlu0  ;;  %v921_v37 = vpop.trf.xlu1  ;;  %v1250_v42 = vld [vmem:[%s2924_s29 + $0x618] sm:$0xff] }
 0x177   : > { %2594 = vmatprep.subr.bf16.mxu0 %v2593_v21  ;;  %v2607_v21 = vpack.c.bf16 %v1282_v11, %v1279_v10  ;;  %v1253_v10 = vld [vmem:[%s2924_s29 + $0x630] sm:$0xff]  ;;  %v1256_v11 = vld [vmem:[%s2924_s29 + $0x648] sm:$0xff] }
 0x178   : > { %1839 = vmatmul.mubr.f32.gmra.mrb[24].mxu0 %v3488_v5 }
 0x179   : > { %2436 = vmatpush1.bf16.msra.mxu1 %v2435_v34  ;;  %2596 = vmatpush3.bf16.msra.mxu0 %v2595_v30  ;;  %v1288_v34 = vld [vmem:[%s2924_s29 + $0x748] sm:$0xff]  ;;  %v1242_v30 = vld [vmem:[%s2924_s29 + $0x5d8] sm:$0xff] }
 0x17a   : > { %1843 = vmatprep.mubr.f32.mxu0 %v3496_v32  ;;  %2438 = vmatprep.subr.bf16.mxu1 %v2437_v9  ;;  %v2713_v19 = vpop.eup %2712  ;;  %v2609_v9 = vpack.c.bf16 %v1336_v22, %v1333_v58  ;;  %v2611_v39 = vpack.c.bf16 %v1288_v34, %v1285_v20  ;;  %v2453_v60 = vpack.c.bf16 %v1245_v33, %v1242_v30  ;;  %v954_v51 = vpop.trf.xlu0  ;;  %v1265_v30 = vld [vmem:[%s2924_s29 + $0x690] sm:$0xff]  ;;  %v1275_v33 = vld [vmem:[%s2924_s29 + $0x6e0] sm:$0xff] }
 0x17b   : > { %2598 = vmatprep.subr.bf16.mxu0 %v2597_v38  ;;  %v3560_v31 = vrot.slane %v2713_v19, %v3275_v41  ;;  %v2715_v38 = vpop.eup %2714  ;;  %v922_v61 = vpop.trf.xlu1  ;;  %v2463_v19 = vpack.c.bf16 %v1256_v11, %v1253_v10  ;;  %v2469_v34 = vpack.c.bf16 %v1269_v25, %v1266_v24  ;;  %v1295_v10 = vld [vmem:[%s2924_s29 + $0x780] sm:$0xff]  ;;  %v1298_v11 = vld [vmem:[%s2924_s29 + $0x798] sm:$0xff] }
 0x17c   : > { %1844 = vmatmul.mubr.f32.gmra.mrb[26].mxu0 %v3506_v29  ;;  %v3581_v54 = vrot.slane %v2715_v38, %v3275_v41  ;;  %v1254_v41 = vld [vmem:[%s2924_s29 + $0x638] sm:$0xff]  ;;  %v1307_v24 = vld [vmem:[%s2924_s29 + $0x7e0] sm:$0xff] }
 0x17d   : > { %2440 = vmatpush1.bf16.msra.mxu1 %v2439_v46  ;;  %2600 = vmatpush3.bf16.msra.mxu0 %v2599_v47  ;;  %v1244_v46 = vld [vmem:[%s2924_s29 + $0x5e8] sm:$0xff]  ;;  %v1291_v47 = vld [vmem:[%s2924_s29 + $0x760] sm:$0xff]  ;;  %v3576_v45 = vmul.f32 %v3560_v31, %v3521_v7  ;;  %v2461_v28 = vpack.c.bf16 %v1257_v2, %v1254_v41  ;;  %v3608_v58 = vmul.f32 %v3560_v31, %v954_v51  ;;  %v1293_v41 = vld [vmem:[%s2924_s29 + $0x770] sm:$0xff] }
 0x17e   : > { %1848 = vmatprep.mubr.f32.mxu0 %v3514_v3  ;;  %2442 = vmatprep.subr.bf16.mxu1 %v2441_v16  ;;  %v1251_v16 = vld [vmem:[%s2924_s29 + $0x620] sm:$0xff]  ;;  %v2455_v55 = vpack.c.bf16 %v1244_v46, %v1241_v43  ;;  %v955_v8 = vpop.trf.xlu0  ;;  %v1278_v43 = vld [vmem:[%s2924_s29 + $0x6f8] sm:$0xff] }
 0x17f   : > { %2602 = vmatprep.subr.bf16.mxu0 %v2601_v59  ;;  %v2615_v59 = vpack.c.bf16 %v1294_v48, %v1291_v47  ;;  %v2457_v56 = vpack.c.bf16 %v1251_v16, %v1248_v50  ;;  %v1247_v7 = vld [vmem:[%s2924_s29 + $0x600] sm:$0xff]  ;;  %v923_v18 = vpop.trf.xlu1  ;;  %v3622_v20 = vmul.f32 %v3560_v31, %v955_v8  ;;  %v1277_v48 = vld [vmem:[%s2924_s29 + $0x6f0] sm:$0xff]  ;;  %v1280_v50 = vld [vmem:[%s2924_s29 + $0x708] sm:$0xff] }
 0x180   : > { %1849 = vmatmul.mubr.f32.gmra.mrb[28].mxu0 %v3526_v52  ;;  %v1284_v16 = vld [vmem:[%s2924_s29 + $0x728] sm:$0xff]  ;;  %v1287_v51 = vld [vmem:[%s2924_s29 + $0x740] sm:$0xff]  ;;  %v1310_v25 = vld [vmem:[%s2924_s29 + $0x7f8] sm:$0xff] }
 0x181   : > { %2444 = vmatpush1.bf16.msra.mxu1 %v2443_v49  ;;  %2604 = vmatpush3.bf16.msra.mxu0 %v2603_v4  ;;  %v3591_v49 = vmul.f32 %v3581_v54, %v3531_v6  ;;  %v2459_v4 = vpack.c.bf16 %v1250_v42, %v1247_v7  ;;  %v3603_v6 = vmul.f32 %v3581_v54, %v921_v37  ;;  %v1286_v7 = vld [vmem:[%s2924_s29 + $0x738] sm:$0xff]  ;;  %v1292_v8 = vld [vmem:[%s2924_s29 + $0x768] sm:$0xff] }
 0x182   : > { %1853 = vmatprep.mubr.f32.mxu0 %v3536_v57  ;;  %2446 = vmatprep.subr.bf16.mxu1 %v2445_v63  ;;  %v3594_v63 = vmul.f32 %v3560_v31, %v953_v27  ;;  %v1290_v42 = vld [vmem:[%s2924_s29 + $0x758] sm:$0xff] }
 0x183   : > { %2606 = vmatprep.subr.bf16.mxu0 %v2605_v13  ;;  %v1260_v13 = vld [vmem:[%s2924_s29 + $0x668] sm:$0xff]  ;;  %v2485_v2 = vpack.c.bf16 %v1293_v41, %v1290_v42  ;;  %v1337_v41 = vld [vmem:[%s2924_s29 + $0x8d0] sm:$0xff] }
 0x184   : > { %1854 = vmatmul.mubr.f32.gmra.mrb[30].mxu0 %v3546_v15  ;;  %v2465_v22 = vpack.c.bf16 %v1263_v14, %v1260_v13  ;;  %v1302_v13 = vld [vmem:[%s2924_s29 + $0x7b8] sm:$0xff]  ;;  %v1305_v14 = vld [vmem:[%s2924_s29 + $0x7d0] sm:$0xff] }
 0x185   : > { %2448 = vmatpush1.bf16.msra.mxu1 %v2447_v23  ;;  %2608 = vmatpush3.bf16.msra.mxu0 %v2607_v21  ;;  %v1259_v23 = vld [vmem:[%s2924_s29 + $0x660] sm:$0xff]  ;;  %v1262_v21 = vld [vmem:[%s2924_s29 + $0x678] sm:$0xff] }
 0x186   : > { %1858 = vmatprep.mubr.f32.mxu0 %v3554_v62  ;;  %2450 = vmatprep.subr.bf16.mxu1 %v2449_v26  ;;  %v2467_v27 = vpack.c.bf16 %v1262_v21, %v1259_v23  ;;  %v924_v26 = vpop.trf.xlu1  ;;  %v1308_v23 = vld [vmem:[%s2924_s29 + $0x7e8] sm:$0xff] }
 0x187   : > { %2610 = vmatprep.subr.bf16.mxu0 %v2609_v9  ;;  %v1272_v9 = vld [vmem:[%s2924_s29 + $0x6c8] sm:$0xff] }
 0x188   : > { %1859 = vmatmul.mubr.f32.gmra.mrb[32].mxu0 %v3567_v17  ;;  %v2473_v38 = vpack.c.bf16 %v1275_v33, %v1272_v9  ;;  %v1316_v9 = vld [vmem:[%s2924_s29 + $0x828] sm:$0xff] }
 0x189   : > { %2452 = vmatpush1.bf16.msra.mxu1 %v2451_v40  ;;  %2612 = vmatpush3.bf16.msra.mxu0 %v2611_v39  ;;  %v1271_v40 = vld [vmem:[%s2924_s29 + $0x6c0] sm:$0xff]  ;;  %v1320_v33 = vld [vmem:[%s2924_s29 + $0x848] sm:$0xff] }
 0x18a   : > { %2454 = vmatprep.subr.bf16.mxu1 %v2453_v60  ;;  %2614 = vmatprep.subr.bf16.mxu0 %v2613_v44  ;;  %v925_v39 = vpop.trf.xlu1  ;;  %v1281_v60 = vld [vmem:[%s2924_s29 + $0x710] sm:$0xff] }
 0x18b   : > { %1928 = vmatprep.mubr.f32.mxu0 %v3576_v45  ;;  %v2477_v47 = vpack.c.bf16 %v1281_v60, %v1278_v43  ;;  %v1329_v43 = vld [vmem:[%s2924_s29 + $0x890] sm:$0xff] }
 0x18d   : > { %2456 = vmatpush1.bf16.msra.mxu1 %v2455_v55  ;;  %2616 = vmatpush3.bf16.msra.mxu0 %v2615_v59  ;;  %v2479_v59 = vpack.c.bf16 %v1280_v50, %v1277_v48  ;;  %v1328_v48 = vld [vmem:[%s2924_s29 + $0x888] sm:$0xff] }
 0x18e   : > { %2458 = vmatprep.subr.bf16.mxu1 %v2457_v56  ;;  %v926_v55 = vpop.trf.xlu1  ;;  %v2481_v56 = vpack.c.bf16 %v1287_v51, %v1284_v16  ;;  %v1332_v50 = vld [vmem:[%s2924_s29 + $0x8a8] sm:$0xff] }
 0x190   : > { %1515 = vmatmul.mubr.f32.vlgmr.msra.gmra.mrb[0].mxu1 %v3447_v53  ;;  %1929 = vmatmul.mubr.f32.vlgmr.msra.gmra.mrb[34].mxu0 %v3591_v49  ;;  %v956_v53 = vpop.trf.xlu0 }
 0x191   : > { %1520 = vmatprep.mubr.f32.mxu1 %v3456_v0  ;;  %2460 = vmatpush1.bf16.msra.mxu1 %v2459_v4  ;;  %v3617_v0 = vmul.f32 %v3581_v54, %v922_v61  ;;  %v3636_v37 = vmul.f32 %v3560_v31, %v956_v53  ;;  %v1289_v4 = vld [vmem:[%s2924_s29 + $0x750] sm:$0xff] }
 0x192   : > { %1933 = vmatprep.mubr.f32.mxu0 %v3594_v63  ;;  %2462 = vmatprep.subr.bf16.mxu1 %v2461_v28  ;;  %v1299_v28 = vld [vmem:[%s2924_s29 + $0x7a0] sm:$0xff] }
 0x194   : > { %1521 = vmatmul.mubr.f32.gmra.mrb[2].mxu1 %v3466_v12  ;;  %1934 = vmatmul.mubr.f32.gmra.mrb[36].mxu0 %v3603_v6  ;;  %v1268_v12 = vld [vmem:[%s2924_s29 + $0x6a8] sm:$0xff]  ;;  %v957_v36 = vpop.trf.xlu0 }
 0x195   : > { %1526 = vmatprep.mubr.f32.mxu1 %v3476_v1  ;;  %2464 = vmatpush1.bf16.msra.mxu1 %v2463_v19  ;;  %v3631_v1 = vmul.f32 %v3581_v54, %v923_v18  ;;  %v2471_v35 = vpack.c.bf16 %v1268_v12, %v1265_v30  ;;  %v3650_v46 = vmul.f32 %v3560_v31, %v957_v36  ;;  %v1301_v19 = vld [vmem:[%s2924_s29 + $0x7b0] sm:$0xff] }
 0x196   : > { %1938 = vmatprep.mubr.f32.mxu0 %v3608_v58  ;;  %2466 = vmatprep.subr.bf16.mxu1 %v2465_v22  ;;  %v2493_v18 = vpack.c.bf16 %v1305_v14, %v1302_v13  ;;  %v1304_v22 = vld [vmem:[%s2924_s29 + $0x7c8] sm:$0xff]  ;;  %v1313_v12 = vld [vmem:[%s2924_s29 + $0x810] sm:$0xff] }
 0x197   : > { %v2495_v21 = vpack.c.bf16 %v1304_v22, %v1301_v19  ;;  %v2503_v36 = vpack.c.bf16 %v1316_v9, %v1313_v12 }
 0x198   : > { %1527 = vmatmul.mubr.f32.gmra.mrb[4].mxu1 %v3488_v5  ;;  %1939 = vmatmul.mubr.f32.gmra.mrb[38].mxu0 %v3617_v0  ;;  %v1274_v5 = vld [vmem:[%s2924_s29 + $0x6d8] sm:$0xff] }
 0x199   : > { %1532 = vmatprep.mubr.f32.mxu1 %v3496_v32  ;;  %2468 = vmatpush1.bf16.msra.mxu1 %v2467_v27  ;;  %v3645_v32 = vmul.f32 %v3581_v54, %v924_v26  ;;  %v2475_v44 = vpack.c.bf16 %v1274_v5, %v1271_v40  ;;  %v1314_v27 = vld [vmem:[%s2924_s29 + $0x818] sm:$0xff]  ;;  %v1317_v26 = vld [vmem:[%s2924_s29 + $0x830] sm:$0xff]  ;;  %v1319_v40 = vld [vmem:[%s2924_s29 + $0x840] sm:$0xff] }
 0x19a   : > { %1943 = vmatprep.mubr.f32.mxu0 %v3622_v20  ;;  %2470 = vmatprep.subr.bf16.mxu1 %v2469_v34  ;;  %v2499_v34 = vpack.c.bf16 %v1310_v25, %v1307_v24  ;;  %v2501_v30 = vpack.c.bf16 %v1317_v26, %v1314_v27  ;;  %v1322_v5 = vld [vmem:[%s2924_s29 + $0x858] sm:$0xff] }
 0x19b   : > { %v2507_v60 = vpack.c.bf16 %v1322_v5, %v1319_v40 }
 0x19c   : > { %1533 = vmatmul.mubr.f32.gmra.mrb[6].mxu1 %v3506_v29  ;;  %1944 = vmatmul.mubr.f32.gmra.mrb[40].mxu0 %v3631_v1  ;;  %v958_v29 = vpop.trf.xlu0 }
 0x19d   : > { %1538 = vmatprep.mubr.f32.mxu1 %v3514_v3  ;;  %2472 = vmatpush1.bf16.msra.mxu1 %v2471_v35  ;;  %v3659_v3 = vmul.f32 %v3581_v54, %v925_v39  ;;  %v3664_v61 = vmul.f32 %v3560_v31, %v958_v29  ;;  %v1323_v35 = vld [vmem:[%s2924_s29 + $0x860] sm:$0xff]  ;;  %v1326_v39 = vld [vmem:[%s2924_s29 + $0x878] sm:$0xff] }
 0x19e   : > { %1948 = vmatprep.mubr.f32.mxu0 %v3636_v37  ;;  %2474 = vmatprep.subr.bf16.mxu1 %v2473_v38  ;;  %v2505_v38 = vpack.c.bf16 %v1323_v35, %v1320_v33  ;;  %v1335_v29 = vld [vmem:[%s2924_s29 + $0x8c0] sm:$0xff] }
 0x19f   : > { %v2513_v51 = vpack.c.bf16 %v1335_v29, %v1332_v50  ;;  %v1036_v29 = vld [vmem:[%s3871_s5 + $0x10] sm:$0xff] }
 0x1a0   : > { %1539 = vmatmul.mubr.f32.gmra.mrb[8].mxu1 %v3526_v52  ;;  %1949 = vmatmul.mubr.f32.gmra.mrb[42].mxu0 %v3645_v32  ;;  %v1283_v52 = vld [vmem:[%s2924_s29 + $0x720] sm:$0xff] }
 0x1a1   : > { %1544 = vmatprep.mubr.f32.mxu1 %v3536_v57  ;;  %2476 = vmatpush1.bf16.msra.mxu1 %v2475_v44  ;;  %v3673_v57 = vmul.f32 %v3581_v54, %v926_v55  ;;  %v2483_v31 = vpack.c.bf16 %v1286_v7, %v1283_v52  ;;  %v2509_v44 = vpack.c.bf16 %v1329_v43, %v1326_v39  ;;  %v1331_v55 = vld [vmem:[%s2924_s29 + $0x8a0] sm:$0xff]  ;;  %v1341_v52 = vld [vmem:[%s2924_s29 + $0x8f0] sm:$0xff] }
 0x1a2   : > { %1953 = vmatprep.mubr.f32.mxu0 %v3650_v46  ;;  %2478 = vmatprep.subr.bf16.mxu1 %v2477_v47  ;;  %v1325_v47 = vld [vmem:[%s2924_s29 + $0x870] sm:$0xff] }
 0x1a3   : > { %v2511_v16 = vpack.c.bf16 %v1328_v48, %v1325_v47 }
 0x1a4   : > { %1545 = vmatmul.mubr.f32.gmra.mrb[10].mxu1 %v3546_v15  ;;  %1954 = vmatmul.mubr.f32.gmra.mrb[44].mxu0 %v3659_v3  ;;  %v1296_v15 = vld [vmem:[%s2924_s29 + $0x788] sm:$0xff] }
 0x1a5   : > { %1550 = vmatprep.mubr.f32.mxu1 %v3554_v62  ;;  %2480 = vmatpush1.bf16.msra.mxu1 %v2479_v59  ;;  %v2487_v62 = vpack.c.bf16 %v1292_v8, %v1289_v4  ;;  %v2489_v54 = vpack.c.bf16 %v1299_v28, %v1296_v15  ;;  %v1334_v59 = vld [vmem:[%s2924_s29 + $0x8b8] sm:$0xff] }
 0x1a6   : > { %1958 = vmatprep.mubr.f32.mxu0 %v3664_v61  ;;  %2482 = vmatprep.subr.bf16.mxu1 %v2481_v56  ;;  %v1338_v56 = vld [vmem:[%s2924_s29 + $0x8d8] sm:$0xff]  ;;  %v2515_v7 = vpack.c.bf16 %v1334_v59, %v1331_v55 }
 0x1a7   : > { %v2517_v42 = vpack.c.bf16 %v1341_v52, %v1338_v56  ;;  %v1039_v52 = vld [vmem:[%s3871_s5 + $0x28] sm:$0xff] }
 0x1a8   : > { %1551 = vmatmul.mubr.f32.gmra.mrb[12].mxu1 %v3567_v17  ;;  %1959 = vmatmul.mubr.f32.gmra.mrb[46].mxu0 %v3673_v57  ;;  %v2491_v17 = vpack.c.bf16 %v1298_v11, %v1295_v10 }
 0x1a9   : > { %2484 = vmatpush1.bf16.msra.mxu1 %v2483_v31  ;;  %1621 = vmatprep.mubr.f32.mxu1 %v3576_v45  ;;  %v1311_v45 = vld [vmem:[%s2924_s29 + $0x800] sm:$0xff]  ;;  %v1340_v31 = vld [vmem:[%s2924_s29 + $0x8e8] sm:$0xff] }
 0x1aa   : > { %2486 = vmatprep.subr.bf16.mxu1 %v2485_v2  ;;  %v2497_v53 = vpack.c.bf16 %v1311_v45, %v1308_v23  ;;  %v2519_v2 = vpack.c.bf16 %v1340_v31, %v1337_v41 }
 0x1ad   : > { %2488 = vmatpush1.bf16.msra.mxu1 %v2487_v62 }
 0x1ae   : > { %2490 = vmatprep.subr.bf16.mxu1 %v2489_v54 }
 0x1b1   : > { %2492 = vmatpush1.bf16.msra.mxu1 %v2491_v17 }
 0x1b2   : > { %2494 = vmatprep.subr.bf16.mxu1 %v2493_v18 }
 0x1b5   : > { %2496 = vmatpush1.bf16.msra.mxu1 %v2495_v21 }
 0x1b6   : > { %2498 = vmatprep.subr.bf16.mxu1 %v2497_v53 }
 0x1b9   : > { %2500 = vmatpush1.bf16.msra.mxu1 %v2499_v34 }
 0x1ba   : > { %2502 = vmatprep.subr.bf16.mxu1 %v2501_v30 }
 0x1bd   : > { %2504 = vmatpush1.bf16.msra.mxu1 %v2503_v36 }
 0x1be   : > { %2506 = vmatprep.subr.bf16.mxu1 %v2505_v38 }
 0x1c1   : > { %2508 = vmatpush1.bf16.msra.mxu1 %v2507_v60 }
 0x1c2   : > { %2510 = vmatprep.subr.bf16.mxu1 %v2509_v44 }
 0x1c5   : > { %2512 = vmatpush1.bf16.msra.mxu1 %v2511_v16 }
 0x1c6   : > { %2514 = vmatprep.subr.bf16.mxu1 %v2513_v51 }
 0x1c9   : > { %2516 = vmatpush1.bf16.msra.mxu1 %v2515_v7 }
 0x1ca   : > { %2518 = vmatprep.subr.bf16.mxu1 %v2517_v42 }
 0x1cd   : > { %2520 = vmatpush1.bf16.msra.mxu1 %v2519_v2 }
 0x1d0   : > { %1622 = vmatmul.mubr.f32.vlgmr.msra.gmra.mrb[0].mxu1 %v3591_v49 }
 0x1d1   : > { %1627 = vmatprep.mubr.f32.mxu1 %v3594_v63 }
 0x1d4   : > { %1628 = vmatmul.mubr.f32.gmra.mrb[2].mxu1 %v3603_v6 }
 0x1d5   : > { %1633 = vmatprep.mubr.f32.mxu1 %v3608_v58 }
 0x1d8   : > { %1634 = vmatmul.mubr.f32.gmra.mrb[4].mxu1 %v3617_v0 }
 0x1d9   : > { %1639 = vmatprep.mubr.f32.mxu1 %v3622_v20 }
 0x1dc   : > { %1640 = vmatmul.mubr.f32.gmra.mrb[6].mxu1 %v3631_v1 }
 0x1dd   : > { %1645 = vmatprep.mubr.f32.mxu1 %v3636_v37 }
 0x1e0   : > { %1646 = vmatmul.mubr.f32.gmra.mrb[8].mxu1 %v3645_v32 }
 0x1e1   : > { %1651 = vmatprep.mubr.f32.mxu1 %v3650_v46 }
 0x1e4   : > { %1652 = vmatmul.mubr.f32.gmra.mrb[10].mxu1 %v3659_v3 }
 0x1e5   : > { %1657 = vmatprep.mubr.f32.mxu1 %v3664_v61 }
 0x1e8   : > { %1658 = vmatmul.mubr.f32.gmra.mrb[12].mxu1 %v3673_v57 }
 0x223   : > { %v2130_v49 = vpop.f32.mrb[6].mxu0 }
 0x224   : > { %v2131_v63 = vpop.f32.mrb[7].mxu0 }
 0x225   : > { %v2132_v6 = vadd.f32 %v2131_v63, %v2130_v49  ;;  %v1042_v49 = vld [vmem:[%s3871_s5 + $0x40] sm:$0xff] }
 0x227   : > { %v2133_v58 = vpop.f32.mrb[8].mxu0 }
 0x228   : > { %v2134_v0 = vpop.f32.mrb[9].mxu0 }
 0x229   : > { %v2135_v20 = vadd.f32 %v2134_v0, %v2133_v58 }
 0x22b   : > { %v2136_v4 = vpop.f32.mrb[10].mxu0 }
 0x22c   : > { %v2137_v1 = vpop.f32.mrb[11].mxu0 }
 0x22d   : > { %v2138_v8 = vadd.f32 %v2137_v1, %v2136_v4  ;;  %v1045_v4 = vld [vmem:[%s3871_s5 + $0x58] sm:$0xff] }
 0x22f   : > { %v2139_v37 = vpop.f32.mrb[12].mxu0 }
 0x230   : > { %v2140_v15 = vpop.f32.mrb[13].mxu0 }
 0x231   : > { %v2141_v32 = vadd.f32 %v2140_v15, %v2139_v37 }
 0x233   : > { %v2142_v28 = vpop.f32.mrb[14].mxu0 }
 0x234   : > { %v2143_v46 = vpop.f32.mrb[15].mxu0 }
 0x235   : > { %v2144_v62 = vadd.f32 %v2143_v46, %v2142_v28  ;;  %v1048_v28 = vld [vmem:[%s3871_s5 + $0x70] sm:$0xff] }
 0x237   : > { %v2145_v3 = vpop.f32.mrb[16].mxu0 }
 0x238   : > { %v2146_v54 = vpop.f32.mrb[17].mxu0 }
 0x239   : > { %v2147_v61 = vadd.f32 %v2146_v54, %v2145_v3 }
 0x23b   : > { %v2148_v10 = vpop.f32.mrb[18].mxu0 }
 0x23c   : > { %v2149_v57 = vpop.f32.mrb[19].mxu0 }
 0x23d   : > { %v2150_v11 = vadd.f32 %v2149_v57, %v2148_v10  ;;  %v1051_v10 = vld [vmem:[%s3871_s5 + $0x88] sm:$0xff] }
 0x243   : > { %v2183_v13 = vpop.f32.mrb[20].mxu0 }
 0x244   : > { %v2184_v14 = vpop.f32.mrb[21].mxu0 }
 0x245   : > { %v2185_v17 = vadd.f32 %v2184_v14, %v2183_v13 }
 0x247   : > { %v1831_v18 = vadd.f32 %v2185_v17, %v2132_v6  ;;  %v2186_v19 = vpop.f32.mrb[22].mxu0 }
 0x248   : > { %v2187_v22 = vpop.f32.mrb[23].mxu0 }
 0x249   : > { %v2188_v23 = vadd.f32 %v2187_v22, %v2186_v19 }
 0x24b   : > { %v1836_v45 = vadd.f32 %v2188_v23, %v2135_v20  ;;  %v2189_v21 = vpop.f32.mrb[24].mxu0  ;;  %v1034_v23 = vld [vmem:[%s3871_s5] sm:$0xff] }
 0x24c   : > { %v2190_v53 = vpop.f32.mrb[25].mxu0 }
 0x24d   : > { %v2191_v24 = vadd.f32 %v2190_v53, %v2189_v21 }
 0x24f   : > { %v1841_v25 = vadd.f32 %v2191_v24, %v2138_v8  ;;  %v2192_v27 = vpop.f32.mrb[26].mxu0 }
 0x250   : > { %v2193_v26 = vpop.f32.mrb[27].mxu0 }
 0x251   : > { %v2194_v34 = vadd.f32 %v2193_v26, %v2192_v27  ;;  %v1037_v27 = vld [vmem:[%s3871_s5 + $0x18] sm:$0xff]  ;;  %v1038_v26 = vld [vmem:[%s3871_s5 + $0x20] sm:$0xff] }
 0x253   : > { %v1846_v30 = vadd.f32 %v2194_v34, %v2141_v32  ;;  %v2195_v12 = vpop.f32.mrb[28].mxu0 }
 0x254   : > { %v2196_v9 = vpop.f32.mrb[29].mxu0 }
 0x255   : > { %v2197_v33 = vadd.f32 %v2196_v9, %v2195_v12 }
 0x257   : > { %v1851_v35 = vadd.f32 %v2197_v33, %v2144_v62  ;;  %v2198_v36 = vpop.f32.mrb[30].mxu0  ;;  %v1040_v33 = vld [vmem:[%s3871_s5 + $0x30] sm:$0xff] }
 0x258   : > { %v2199_v38 = vpop.f32.mrb[31].mxu0 }
 0x259   : > { %v2200_v40 = vadd.f32 %v2199_v38, %v2198_v36 }
 0x25b   : > { %v1856_v5 = vadd.f32 %v2200_v40, %v2147_v61  ;;  %v2201_v39 = vpop.f32.mrb[32].mxu0 }
 0x25c   : > { %v2202_v43 = vpop.f32.mrb[33].mxu0 }
 0x25d   : > { %v2203_v60 = vadd.f32 %v2202_v43, %v2201_v39  ;;  %v1043_v39 = vld [vmem:[%s3871_s5 + $0x48] sm:$0xff]  ;;  %v1044_v43 = vld [vmem:[%s3871_s5 + $0x50] sm:$0xff] }
 0x25f   : > { %v1861_v44 = vadd.f32 %v2203_v60, %v2150_v11 }
 0x263   : > { %v2236_v47 = vpop.f32.mrb[34].mxu0 }
 0x264   : > { %v2237_v48 = vpop.f32.mrb[35].mxu0 }
 0x265   : > { %v2238_v50 = vadd.f32 %v2237_v48, %v2236_v47 }
 0x267   : > { %v1931_v16 = vadd.f32 %v2238_v50, %v1831_v18  ;;  %v2239_v51 = vpop.f32.mrb[36].mxu0  ;;  %v1054_v18 = vld [vmem:[%s3871_s5 + $0xa0] sm:$0x1] }
 0x268   : > { %v2240_v55 = vpop.f32.mrb[37].mxu0  ;;  %v1046_v50 = vld [vmem:[%s3871_s5 + $0x60] sm:$0xff] }
 0x269   : > { %v1966_v59 = vadd.f32 %v1931_v16, %v1036_v29  ;;  %v2241_v56 = vadd.f32 %v2240_v55, %v2239_v51  ;;  %v1047_v29 = vld [vmem:[%s3871_s5 + $0x68] sm:$0xff] }
 0x26b   : > { %1987 = vst [vmem:[%s3871_s5 + $0x10] sm:$0xff] %v1966_v59  ;;  %v1936_v7 = vadd.f32 %v2241_v56, %v1836_v45  ;;  %v2242_v42 = vpop.f32.mrb[38].mxu0  ;;  %v1035_v45 = vld [vmem:[%s3871_s5 + $0x8] sm:$0xff]  ;;  %v1049_v56 = vld [vmem:[%s3871_s5 + $0x78] sm:$0xff] }
 0x26c   : > { %v2243_v41 = vpop.f32.mrb[39].mxu0 }
 0x26d   : > { %v1969_v31 = vadd.f32 %v1936_v7, %v1039_v52  ;;  %v2244_v2 = vadd.f32 %v2243_v41, %v2242_v42  ;;  %v1050_v52 = vld [vmem:[%s3871_s5 + $0x80] sm:$0xff] }
 0x26f   : > { %1990 = vst [vmem:[%s3871_s5 + $0x28] sm:$0xff] %v1969_v31  ;;  %v1941_v63 = vadd.f32 %v2244_v2, %v1841_v25  ;;  %v2245_v6 = vpop.f32.mrb[40].mxu0  ;;  %v1052_v2 = vld [vmem:[%s3871_s5 + $0x90] sm:$0x1] }
 0x270   : > { %v2246_v58 = vpop.f32.mrb[41].mxu0 }
 0x271   : > { %v1972_v0 = vadd.f32 %v1941_v63, %v1042_v49  ;;  %v2247_v20 = vadd.f32 %v2246_v58, %v2245_v6  ;;  %v1053_v49 = vld [vmem:[%s3871_s5 + $0x98] sm:$0x1] }
 0x273   : > { %1993 = vst [vmem:[%s3871_s5 + $0x40] sm:$0xff] %v1972_v0  ;;  %v1946_v1 = vadd.f32 %v2247_v20, %v1846_v30  ;;  %v2248_v8 = vpop.f32.mrb[42].mxu0 }
 0x274   : > { %v2249_v37 = vpop.f32.mrb[43].mxu0 }
 0x275   : > { %v1975_v15 = vadd.f32 %v1946_v1, %v1045_v4  ;;  %v2250_v32 = vadd.f32 %v2249_v37, %v2248_v8 }
 0x277   : > { %1996 = vst [vmem:[%s3871_s5 + $0x58] sm:$0xff] %v1975_v15  ;;  %v1951_v46 = vadd.f32 %v2250_v32, %v1851_v35  ;;  %v2251_v62 = vpop.f32.mrb[44].mxu0  ;;  %v1041_v35 = vld [vmem:[%s3871_s5 + $0x38] sm:$0xff] }
 0x278   : > { %v2252_v3 = vpop.f32.mrb[45].mxu0 }
 0x279   : > { %v1978_v54 = vadd.f32 %v1951_v46, %v1048_v28  ;;  %v2253_v61 = vadd.f32 %v2252_v3, %v2251_v62 }
 0x27b   : > { %1999 = vst [vmem:[%s3871_s5 + $0x70] sm:$0xff] %v1978_v54  ;;  %v1956_v57 = vadd.f32 %v2253_v61, %v1856_v5  ;;  %v2254_v11 = vpop.f32.mrb[46].mxu0 }
 0x27c   : > { %v2255_v13 = vpop.f32.mrb[47].mxu0 }
 0x27d   : > { %v1981_v14 = vadd.f32 %v1956_v57, %v1051_v10  ;;  %v2256_v17 = vadd.f32 %v2255_v13, %v2254_v11 }
 0x27f   : > { %2002 = vst [vmem:[%s3871_s5 + $0x88] sm:$0xff] %v1981_v14  ;;  %v1961_v19 = vadd.f32 %v2256_v17, %v1861_v44 }
 0x281   : > { %v1984_v22 = vadd.f32 %v1961_v19, %v1054_v18 }
 0x283   : > { %2005 = vst [vmem:[%s3871_s5 + $0xa0] sm:$0x1] %v1984_v22 }
 0x2a3   : > { %v1623_v21 = vpop.f32.mrb[0].mxu1 }
 0x2a4   : > { %v1964_v53 = vadd.f32 %v1623_v21, %v1034_v23  ;;  %v1625_v24 = vpop.f32.mrb[1].mxu1 }
 0x2a5   : > { %v1965_v25 = vadd.f32 %v1625_v24, %v1035_v45 }
 0x2a6   : > { %1985 = vst [vmem:[%s3871_s5] sm:$0xff] %v1964_v53 }
 0x2a7   : > { %1986 = vst [vmem:[%s3871_s5 + $0x8] sm:$0xff] %v1965_v25  ;;  %v1629_v34 = vpop.f32.mrb[2].mxu1 }
 0x2a8   : > { %v1967_v30 = vadd.f32 %v1629_v34, %v1037_v27  ;;  %v1631_v12 = vpop.f32.mrb[3].mxu1 }
 0x2a9   : > { %v1968_v9 = vadd.f32 %v1631_v12, %v1038_v26 }
 0x2aa   : > { %1988 = vst [vmem:[%s3871_s5 + $0x18] sm:$0xff] %v1967_v30 }
 0x2ab   : > { %1989 = vst [vmem:[%s3871_s5 + $0x20] sm:$0xff] %v1968_v9  ;;  %v1635_v36 = vpop.f32.mrb[4].mxu1 }
 0x2ac   : > { %v1970_v38 = vadd.f32 %v1635_v36, %v1040_v33  ;;  %v1637_v40 = vpop.f32.mrb[5].mxu1 }
 0x2ad   : > { %v1971_v5 = vadd.f32 %v1637_v40, %v1041_v35 }
 0x2ae   : > { %1991 = vst [vmem:[%s3871_s5 + $0x30] sm:$0xff] %v1970_v38 }
 0x2af   : > { %1992 = vst [vmem:[%s3871_s5 + $0x38] sm:$0xff] %v1971_v5  ;;  %v1641_v60 = vpop.f32.mrb[6].mxu1 }
 0x2b0   : > { %v1973_v44 = vadd.f32 %v1641_v60, %v1043_v39  ;;  %v1643_v47 = vpop.f32.mrb[7].mxu1 }
 0x2b1   : > { %v1974_v48 = vadd.f32 %v1643_v47, %v1044_v43 }
 0x2b2   : > { %1994 = vst [vmem:[%s3871_s5 + $0x48] sm:$0xff] %v1973_v44 }
 0x2b3   : > { %1995 = vst [vmem:[%s3871_s5 + $0x50] sm:$0xff] %v1974_v48  ;;  %v1647_v16 = vpop.f32.mrb[8].mxu1 }
 0x2b4   : > { %v1976_v51 = vadd.f32 %v1647_v16, %v1046_v50  ;;  %v1649_v55 = vpop.f32.mrb[9].mxu1 }
 0x2b5   : > { %v1977_v59 = vadd.f32 %v1649_v55, %v1047_v29 }
 0x2b6   : > { %1997 = vst [vmem:[%s3871_s5 + $0x60] sm:$0xff] %v1976_v51 }
 0x2b7   : > { %1998 = vst [vmem:[%s3871_s5 + $0x68] sm:$0xff] %v1977_v59  ;;  %v1653_v7 = vpop.f32.mrb[10].mxu1 }
 0x2b8   : > { %v1979_v42 = vadd.f32 %v1653_v7, %v1049_v56  ;;  %v1655_v41 = vpop.f32.mrb[11].mxu1 }
 0x2b9   : > { %v1980_v31 = vadd.f32 %v1655_v41, %v1050_v52 }
 0x2ba   : > { %2000 = vst [vmem:[%s3871_s5 + $0x78] sm:$0xff] %v1979_v42 }
 0x2bb   : > { %2001 = vst [vmem:[%s3871_s5 + $0x80] sm:$0xff] %v1980_v31  ;;  %v1659_v63 = vpop.f32.mrb[12].mxu1 }
 0x2bc   : > { %v1982_v6 = vadd.f32 %v1659_v63, %v1052_v2  ;;  %v1661_v58 = vpop.f32.mrb[13].mxu1 }
 0x2bd   : > { %v1983_v0 = vadd.f32 %v1661_v58, %v1053_v49 }
 0x2be   : > { %2003 = vst [vmem:[%s3871_s5 + $0x90] sm:$0x1] %v1982_v6 }
 0x2bf   : > { %2004 = vst [vmem:[%s3871_s5 + $0x98] sm:$0x1] %v1983_v0 }
 0x2c0 PF: > { %p15_p4 = scmp.ge.s32.totalorder %s2840_s23, 5   ;;  %s3874_s18 = smov %s2772_s19 }
 0x2c1   : > { %s3875_s19 = smov %s2776_s20  ;;  %s3876_s20 = smov %s2850_s26 }
 0x2c2   : > { %s3877_s21 = smov %s2840_s23  ;;  %17 = sbr.rel (!%p15_p4) target bundleno = 3 (0x3), region = 89 }
 0x2c9   :  { %2017 = vsyncpa [#allocation3], 1 }
 0x2ca   :  { %2019 = vsyncpa [#allocation3 + $0x1], 1 }

</bundles_post_ra>
